<compile_context>
chip_gen: v6e
topology: v6e:2x2x1
jax: 0.10.0
libtpu: 0.0.40
codegen_flags: <defaults>
</compile_context>

<pallas_src>
import math
import functools

import numpy as np
import jax
import jax.numpy as jnp
from jax import lax
from jax.experimental import pallas as pl
from jax.experimental.pallas import tpu as pltpu


def _weighted_sum(terms):
    """Trace-time weighted sum of arrays; skips ~zero weights and folds +/-1 weights."""
    acc = None
    for w, a in terms:
        if abs(w) < 1e-12:
            continue
        if abs(w - 1.0) < 1e-12:
            t = a
        elif abs(w + 1.0) < 1e-12:
            t = -a
        else:
            t = w * a
        acc = t if acc is None else acc + t
    if acc is None:
        acc = jnp.zeros_like(terms[0][1])
    return acc


def _corr_dft_kernel(q_ref, k_ref, ce_ref, se_ref, frac_ref, corr_ref, *, h_dim, e_dim):
    """2-D circular cross-correlation over (H, E) + causal scaling for one (b, L-tile) block.

    q_ref, k_ref  : (1, TL, H, E)   queries / keys tile (original dtype)
    ce_ref, se_ref: (E, E)          cos / sin DFT matrices for the channel axis
    frac_ref      : (1, H*E)        causal sqrt-weights, pre-multiplied by 1/(H*E)
    corr_ref      : (1, TL, H*E)    lane-dense correlation output (float32)
    """
    H, E = h_dim, e_dim
    f32 = jnp.float32
    ce = ce_ref[...].astype(f32)
    se = se_ref[...].astype(f32)
    dot = functools.partial(jnp.dot, preferred_element_type=f32)

    # Forward DFT along E (MXU), separately per head (ref-level slicing keeps layouts trivial).
    qr, qi, kr, ki = [], [], [], []
    for h in range(H):
        qh = q_ref[0, :, h, :].astype(f32)            # (TL, E)
        kh = k_ref[0, :, h, :].astype(f32)
        qr.append(dot(qh, ce))
        qi.append(-dot(qh, se))
        kr.append(dot(kh, ce))
        ki.append(-dot(kh, se))

    # Trace-time trig constants for the (small) head axis.
    ch = [[math.cos(2.0 * math.pi * h * g / H) for g in range(H)] for h in range(H)]
    sh = [[math.sin(2.0 * math.pi * h * g / H) for g in range(H)] for h in range(H)]

    # Forward DFT along H (unrolled scalar mixing), cross-spectrum with conj(K_hat),
    # inverse DFT along E (MXU).
    zr, zi = [], []
    for g in range(H):
        QR = _weighted_sum([(ch[h][g], qr[h]) for h in range(H)]
                           + [(sh[h][g], qi[h]) for h in range(H)])
        QI = _weighted_sum([(ch[h][g], qi[h]) for h in range(H)]
                           + [(-sh[h][g], qr[h]) for h in range(H)])
        KR = _weighted_sum([(ch[h][g], kr[h]) for h in range(H)]
                           + [(sh[h][g], ki[h]) for h in range(H)])
        KI = _weighted_sum([(ch[h][g], ki[h]) for h in range(H)]
                           + [(-sh[h][g], kr[h]) for h in range(H)])
        pr = QR * KR + QI * KI
        pi = QI * KR - QR * KI
        zr.append(dot(pr, ce) - dot(pi, se))
        zi.append(dot(pr, se) + dot(pi, ce))

    # Inverse DFT along H (real part only), assembled into one lane-dense (TL, H*E) slab.
    pieces = []
    for h in range(H):
        pieces.append(_weighted_sum([(ch[g][h], zr[g]) for g in range(H)]
                                    + [(-sh[g][h], zi[g]) for g in range(H)]))
    corr = jnp.concatenate(pieces, axis=-1)           # (TL, H*E)
    corr_ref[0] = corr * frac_ref[...]                # frac includes the 1/(H*E) normalization


def _agg_kernel(v_ref, w_ref, out_ref):
    """Time-delay aggregation: a single MXU matmul against the per-batch weighted shift matrix.

    v_ref  : (1, TL*H, E)  values tile (original dtype)
    w_ref  : (1, E, E)     W[b, u, t] = sum_i softmax_w[b, i] * [(u - t) % E == delay_i]
    out_ref: (1, TL*H, E)  float32 aggregation
    """
    v = v_ref[0].astype(jnp.float32)
    out_ref[0] = jnp.dot(v, w_ref[0], preferred_element_type=jnp.float32)


def _choose_l_tile(L, *, max_tile=32):
    """Largest multiple-of-8 divisor of L (sublane-aligned blocks), preferring >=2 L-tiles."""
    cands = [d for d in range(8, min(L, max_tile) + 1, 8) if L % d == 0]
    if not cands:
        return L                      # block == full dim is always a legal block shape
    multi = [d for d in cands if L // d >= 2]
    return max(multi) if multi else max(cands)


def casual_attention_forward(queries, keys, values, *, factor=1.0, order=0.2):
    B, L, H, E = queries.shape
    _, S, _, D = values.shape
    assert D == E, "CasualAttention implicitly assumes value dim == query dim"

    if L > S:
        zeros = jnp.zeros_like(queries[:, :L - S, :, :])
        values = jnp.concatenate([values, zeros], axis=1)
        keys = jnp.concatenate([keys, zeros], axis=1)
    else:
        values = values[:, :L]
        keys = keys[:, :L]

    n = H * E
    TL = _choose_l_tile(L)
    n_l = L // TL

    # Fixed DFT matrices for the channel axis (built once in fp64, cast to f32).
    e_idx = np.arange(E)
    ang = 2.0 * np.pi * np.outer(e_idx, e_idx) / E
    ce = jnp.asarray(np.cos(ang), jnp.float32)
    se = jnp.asarray(np.sin(ang), jnp.float32)

    # Causal fractional weights (same recursion as the PyTorch module's `casual`), with the
    # 1/(H*E) inverse-DFT normalization folded in.
    w_seq = [1.0]
    for i in range(1, n):
        w_seq.append((1.0 + (order + 1.0) / i) * w_seq[-1])
    frac = np.sqrt(np.asarray(w_seq, np.float64)) / float(n)
    frac = jnp.asarray(frac, jnp.float32).reshape(1, n)

    corr_flat = pl.pallas_call(
        functools.partial(_corr_dft_kernel, h_dim=H, e_dim=E),
        out_shape=jax.ShapeDtypeStruct((B, L, n), jnp.float32),
        grid=(B, n_l),
        in_specs=[
            pl.BlockSpec((1, TL, H, E), lambda b, lt: (b, lt, 0, 0)),
            pl.BlockSpec((1, TL, H, E), lambda b, lt: (b, lt, 0, 0)),
            pl.BlockSpec((E, E), lambda b, lt: (0, 0)),
            pl.BlockSpec((E, E), lambda b, lt: (0, 0)),
            pl.BlockSpec((1, n), lambda b, lt: (0, 0)),
        ],
        out_specs=pl.BlockSpec((1, TL, n), lambda b, lt: (b, lt, 0)),
        compiler_params=pltpu.CompilerParams(
            dimension_semantics=("parallel", "parallel")),
    )(queries, keys, ce, se, frac)

    corr = corr_flat.reshape(B, L, H, E)

    # ---- tiny global glue: (L, H) mean, top-k delay selection, softmax (plain JAX) ----
    # TODO(synk): the top-k + softmax are global over the whole (B, L, H) grid, so the
    # aggregation pass cannot be fused into the correlation pallas_call without a cross-grid
    # reduction barrier; they stay in plain JAX on (B, E)/(B, top_k)-sized data.
    mean_value = jnp.mean(corr, axis=(1, 2))                      # (B, E)
    top_k = int(factor * math.log(E))
    _, index = lax.top_k(jnp.mean(mean_value, axis=0), top_k)     # (top_k,) shared over batch
    weights = mean_value[:, index]                                # (B, top_k)
    tmp_corr = jax.nn.softmax(weights, axis=-1).astype(jnp.float32)

    # Per-batch weighted circular-shift matrix, hoisted out of the kernel:
    #   W[b, u, t] = sum_i tmp_corr[b, i] * [ (u - t) % E == index[i] ]
    u = jnp.arange(E, dtype=jnp.int32)[:, None]
    t = jnp.arange(E, dtype=jnp.int32)[None, :]
    diff = jnp.mod(u - t, E)                                      # (E, E)
    onehots = (diff[None, :, :] == index[:, None, None]).astype(jnp.float32)
    w_mat = jnp.einsum('bi,iuv->buv', tmp_corr, onehots)          # (B, E, E)

    v_flat = values.reshape(B, L * H, E)                          # free reshape outside kernel
    v_agg = pl.pallas_call(
        _agg_kernel,
        out_shape=jax.ShapeDtypeStruct((B, L * H, E), jnp.float32),
        grid=(B, n_l),
        in_specs=[
            pl.BlockSpec((1, TL * H, E), lambda b, lt: (b, lt, 0)),
            pl.BlockSpec((1, E, E), lambda b, lt: (b, 0, 0)),
        ],
        out_specs=pl.BlockSpec((1, TL * H, E), lambda b, lt: (b, lt, 0)),
        compiler_params=pltpu.CompilerParams(
            dimension_semantics=("parallel", "parallel")),
    )(v_flat, w_mat)

    return v_agg.reshape(B, L, H, E), corr


def _reference_forward(q, k, v, *, factor=1.0, order=0.2):
    """NumPy reference mirroring the PyTorch forward (training mode) exactly."""
    q = np.asarray(q, np.float32)
    k = np.asarray(k, np.float32)
    v = np.asarray(v, np.float32)
    B, L, H, E = q.shape
    _, S, _, D = v.shape
    if L > S:
        zeros = np.zeros_like(q[:, :L - S, :, :])
        v = np.concatenate([v, zeros], axis=1)
        k = np.concatenate([k, zeros], axis=1)
    else:
        v = v[:, :L]
        k = k[:, :L]
    q_fft = np.fft.rfftn(q, axes=(-2, -1))
    k_fft = np.fft.rfftn(k, axes=(-2, -1))
    corr = np.fft.irfftn(q_fft * np.conj(k_fft), s=(H, D), axes=(-2, -1))
    length = H * D
    w_seq = [1.0]
    for i in range(1, length):
        w_seq.append((1.0 + (order + 1.0) / i) * w_seq[-1])
    frac = np.sqrt(np.asarray(w_seq, np.float64)).reshape(H, D)
    corr = corr * frac[None, None]
    top_k = int(factor * math.log(v.shape[3]))
    mean_value = corr.mean(axis=1).mean(axis=1)               # (B, D)
    index = np.argsort(-mean_value.mean(axis=0))[:top_k]
    weights = mean_value[:, index]                            # (B, top_k)
    w_exp = np.exp(weights - weights.max(axis=-1, keepdims=True))
    tmp_corr = w_exp / w_exp.sum(axis=-1, keepdims=True)
    agg = np.zeros_like(v, dtype=np.float64)
    for i in range(top_k):
        pattern = np.roll(v, -int(index[i]), axis=-1)
        agg = agg + pattern * tmp_corr[:, i][:, None, None, None]
    return agg, corr


if __name__ == "__main__":
    key = jax.random.PRNGKey(0)
    kq, kk, kv = jax.random.split(key, 3)
    B, L, S, H, E = 2, 8, 8, 4, 16
    queries = jax.random.normal(kq, (B, L, H, E), dtype=jnp.float32)
    keys = jax.random.normal(kk, (B, S, H, E), dtype=jnp.float32)
    values = jax.random.normal(kv, (B, S, H, E), dtype=jnp.float32)

    v_out, corr_out = casual_attention_forward(queries, keys, values)
    jax.block_until_ready((v_out, corr_out))

    v_ref, corr_ref = _reference_forward(queries, keys, values)
    assert np.allclose(np.asarray(corr_out), corr_ref, rtol=5e-3, atol=5e-2), "corr mismatch"
    assert np.allclose(np.asarray(v_out), v_ref, rtol=5e-3, atol=5e-2), "V mismatch"
    print("KERNEL_OK")
</pallas_src>

<mosaic_0001>
module attributes {stable_mosaic.version = 11 : i64} {
  func.func @_corr_dft_kernel(%arg0: i32, %arg1: i32, %arg2: memref<1x8x4x16xf32, #tpu.memory_space<vmem>>, %arg3: memref<1x8x4x16xf32, #tpu.memory_space<vmem>>, %arg4: memref<16x16xf32, #tpu.memory_space<vmem>>, %arg5: memref<16x16xf32, #tpu.memory_space<vmem>>, %arg6: memref<1x64xf32, #tpu.memory_space<vmem>>, %arg7: memref<1x8x64xf32, #tpu.memory_space<vmem>>) attributes {dimension_semantics = [#tpu.dimension_semantics<parallel>, #tpu.dimension_semantics<parallel>], iteration_bounds = array<i64: 2, 1>, scalar_prefetch = 0 : i64, scratch_operands = 0 : i64, tpu.core_type = #tpu.core_type<tc>, window_params = [{transform_indices = @transform_0, window_bounds = array<i64: 1, 8, 4, 16>}, {transform_indices = @transform_1, window_bounds = array<i64: 1, 8, 4, 16>}, {pipeline_mode = #tpu.pipeline_mode<synchronous>, transform_indices = @transform_2, window_bounds = array<i64: 16, 16>}, {pipeline_mode = #tpu.pipeline_mode<synchronous>, transform_indices = @transform_3, window_bounds = array<i64: 16, 16>}, {pipeline_mode = #tpu.pipeline_mode<synchronous>, transform_indices = @transform_4, window_bounds = array<i64: 1, 64>}, {transform_indices = @transform_5, window_bounds = array<i64: 1, 8, 64>}]} {
    %c0 = arith.constant 0 : index
    %c0_0 = arith.constant 0 : index
    %0 = vector.load %arg4[%c0, %c0_0] : memref<16x16xf32, #tpu.memory_space<vmem>>, vector<16x16xf32>
    %c0_1 = arith.constant 0 : index
    %c0_2 = arith.constant 0 : index
    %1 = vector.load %arg5[%c0_1, %c0_2] : memref<16x16xf32, #tpu.memory_space<vmem>>, vector<16x16xf32>
    %c0_3 = arith.constant 0 : index
    %c0_4 = arith.constant 0 : index
    %c0_5 = arith.constant 0 : index
    %c0_6 = arith.constant 0 : index
    %2 = vector.load %arg2[%c0_3, %c0_4, %c0_5, %c0_6] : memref<1x8x4x16xf32, #tpu.memory_space<vmem>>, vector<1x8x1x16xf32>
    %3 = vector.shape_cast %2 : vector<1x8x1x16xf32> to vector<8x16xf32>
    %c0_7 = arith.constant 0 : index
    %c0_8 = arith.constant 0 : index
    %c0_9 = arith.constant 0 : index
    %c0_10 = arith.constant 0 : index
    %4 = vector.load %arg3[%c0_7, %c0_8, %c0_9, %c0_10] : memref<1x8x4x16xf32, #tpu.memory_space<vmem>>, vector<1x8x1x16xf32>
    %5 = vector.shape_cast %4 : vector<1x8x1x16xf32> to vector<8x16xf32>
    %cst = arith.constant dense<0.000000e+00> : vector<8x16xf32>
    %6 = tpu.matmul %3, %0, %cst {dimension_numbers = #tpu.dot_dimension_numbers<[1], [0], [0], [1], [0, 0, 1, 1], [], []>} : vector<8x16xf32>, vector<16x16xf32>, vector<8x16xf32> -> vector<8x16xf32>
    %cst_11 = arith.constant dense<0.000000e+00> : vector<8x16xf32>
    %7 = tpu.matmul %3, %1, %cst_11 {dimension_numbers = #tpu.dot_dimension_numbers<[1], [0], [0], [1], [0, 0, 1, 1], [], []>} : vector<8x16xf32>, vector<16x16xf32>, vector<8x16xf32> -> vector<8x16xf32>
    %cst_12 = arith.constant 0.000000e+00 : f32
    %8 = vector.broadcast %cst_12 : f32 to vector<8x16xf32>
    %9 = arith.subf %8, %7 : vector<8x16xf32>
    %cst_13 = arith.constant dense<0.000000e+00> : vector<8x16xf32>
    %10 = tpu.matmul %5, %0, %cst_13 {dimension_numbers = #tpu.dot_dimension_numbers<[1], [0], [0], [1], [0, 0, 1, 1], [], []>} : vector<8x16xf32>, vector<16x16xf32>, vector<8x16xf32> -> vector<8x16xf32>
    %cst_14 = arith.constant dense<0.000000e+00> : vector<8x16xf32>
    %11 = tpu.matmul %5, %1, %cst_14 {dimension_numbers = #tpu.dot_dimension_numbers<[1], [0], [0], [1], [0, 0, 1, 1], [], []>} : vector<8x16xf32>, vector<16x16xf32>, vector<8x16xf32> -> vector<8x16xf32>
    %cst_15 = arith.constant 0.000000e+00 : f32
    %12 = vector.broadcast %cst_15 : f32 to vector<8x16xf32>
    %13 = arith.subf %12, %11 : vector<8x16xf32>
    %c0_16 = arith.constant 0 : index
    %c0_17 = arith.constant 0 : index
    %c1 = arith.constant 1 : index
    %c0_18 = arith.constant 0 : index
    %14 = vector.load %arg2[%c0_16, %c0_17, %c1, %c0_18] : memref<1x8x4x16xf32, #tpu.memory_space<vmem>>, vector<1x8x1x16xf32>
    %15 = vector.shape_cast %14 : vector<1x8x1x16xf32> to vector<8x16xf32>
    %c0_19 = arith.constant 0 : index
    %c0_20 = arith.constant 0 : index
    %c1_21 = arith.constant 1 : index
    %c0_22 = arith.constant 0 : index
    %16 = vector.load %arg3[%c0_19, %c0_20, %c1_21, %c0_22] : memref<1x8x4x16xf32, #tpu.memory_space<vmem>>, vector<1x8x1x16xf32>
    %17 = vector.shape_cast %16 : vector<1x8x1x16xf32> to vector<8x16xf32>
    %cst_23 = arith.constant dense<0.000000e+00> : vector<8x16xf32>
    %18 = tpu.matmul %15, %0, %cst_23 {dimension_numbers = #tpu.dot_dimension_numbers<[1], [0], [0], [1], [0, 0, 1, 1], [], []>} : vector<8x16xf32>, vector<16x16xf32>, vector<8x16xf32> -> vector<8x16xf32>
    %cst_24 = arith.constant dense<0.000000e+00> : vector<8x16xf32>
    %19 = tpu.matmul %15, %1, %cst_24 {dimension_numbers = #tpu.dot_dimension_numbers<[1], [0], [0], [1], [0, 0, 1, 1], [], []>} : vector<8x16xf32>, vector<16x16xf32>, vector<8x16xf32> -> vector<8x16xf32>
    %cst_25 = arith.constant 0.000000e+00 : f32
    %20 = vector.broadcast %cst_25 : f32 to vector<8x16xf32>
    %21 = arith.subf %20, %19 : vector<8x16xf32>
    %cst_26 = arith.constant dense<0.000000e+00> : vector<8x16xf32>
    %22 = tpu.matmul %17, %0, %cst_26 {dimension_numbers = #tpu.dot_dimension_numbers<[1], [0], [0], [1], [0, 0, 1, 1], [], []>} : vector<8x16xf32>, vector<16x16xf32>, vector<8x16xf32> -> vector<8x16xf32>
    %cst_27 = arith.constant dense<0.000000e+00> : vector<8x16xf32>
    %23 = tpu.matmul %17, %1, %cst_27 {dimension_numbers = #tpu.dot_dimension_numbers<[1], [0], [0], [1], [0, 0, 1, 1], [], []>} : vector<8x16xf32>, vector<16x16xf32>, vector<8x16xf32> -> vector<8x16xf32>
    %cst_28 = arith.constant 0.000000e+00 : f32
    %24 = vector.broadcast %cst_28 : f32 to vector<8x16xf32>
    %25 = arith.subf %24, %23 : vector<8x16xf32>
    %c0_29 = arith.constant 0 : index
    %c0_30 = arith.constant 0 : index
    %c2 = arith.constant 2 : index
    %c0_31 = arith.constant 0 : index
    %26 = vector.load %arg2[%c0_29, %c0_30, %c2, %c0_31] : memref<1x8x4x16xf32, #tpu.memory_space<vmem>>, vector<1x8x1x16xf32>
    %27 = vector.shape_cast %26 : vector<1x8x1x16xf32> to vector<8x16xf32>
    %c0_32 = arith.constant 0 : index
    %c0_33 = arith.constant 0 : index
    %c2_34 = arith.constant 2 : index
    %c0_35 = arith.constant 0 : index
    %28 = vector.load %arg3[%c0_32, %c0_33, %c2_34, %c0_35] : memref<1x8x4x16xf32, #tpu.memory_space<vmem>>, vector<1x8x1x16xf32>
    %29 = vector.shape_cast %28 : vector<1x8x1x16xf32> to vector<8x16xf32>
    %cst_36 = arith.constant dense<0.000000e+00> : vector<8x16xf32>
    %30 = tpu.matmul %27, %0, %cst_36 {dimension_numbers = #tpu.dot_dimension_numbers<[1], [0], [0], [1], [0, 0, 1, 1], [], []>} : vector<8x16xf32>, vector<16x16xf32>, vector<8x16xf32> -> vector<8x16xf32>
    %cst_37 = arith.constant dense<0.000000e+00> : vector<8x16xf32>
    %31 = tpu.matmul %27, %1, %cst_37 {dimension_numbers = #tpu.dot_dimension_numbers<[1], [0], [0], [1], [0, 0, 1, 1], [], []>} : vector<8x16xf32>, vector<16x16xf32>, vector<8x16xf32> -> vector<8x16xf32>
    %cst_38 = arith.constant 0.000000e+00 : f32
    %32 = vector.broadcast %cst_38 : f32 to vector<8x16xf32>
    %33 = arith.subf %32, %31 : vector<8x16xf32>
    %cst_39 = arith.constant dense<0.000000e+00> : vector<8x16xf32>
    %34 = tpu.matmul %29, %0, %cst_39 {dimension_numbers = #tpu.dot_dimension_numbers<[1], [0], [0], [1], [0, 0, 1, 1], [], []>} : vector<8x16xf32>, vector<16x16xf32>, vector<8x16xf32> -> vector<8x16xf32>
    %cst_40 = arith.constant dense<0.000000e+00> : vector<8x16xf32>
    %35 = tpu.matmul %29, %1, %cst_40 {dimension_numbers = #tpu.dot_dimension_numbers<[1], [0], [0], [1], [0, 0, 1, 1], [], []>} : vector<8x16xf32>, vector<16x16xf32>, vector<8x16xf32> -> vector<8x16xf32>
    %cst_41 = arith.constant 0.000000e+00 : f32
    %36 = vector.broadcast %cst_41 : f32 to vector<8x16xf32>
    %37 = arith.subf %36, %35 : vector<8x16xf32>
    %c0_42 = arith.constant 0 : index
    %c0_43 = arith.constant 0 : index
    %c3 = arith.constant 3 : index
    %c0_44 = arith.constant 0 : index
    %38 = vector.load %arg2[%c0_42, %c0_43, %c3, %c0_44] : memref<1x8x4x16xf32, #tpu.memory_space<vmem>>, vector<1x8x1x16xf32>
    %39 = vector.shape_cast %38 : vector<1x8x1x16xf32> to vector<8x16xf32>
    %c0_45 = arith.constant 0 : index
    %c0_46 = arith.constant 0 : index
    %c3_47 = arith.constant 3 : index
    %c0_48 = arith.constant 0 : index
    %40 = vector.load %arg3[%c0_45, %c0_46, %c3_47, %c0_48] : memref<1x8x4x16xf32, #tpu.memory_space<vmem>>, vector<1x8x1x16xf32>
    %41 = vector.shape_cast %40 : vector<1x8x1x16xf32> to vector<8x16xf32>
    %cst_49 = arith.constant dense<0.000000e+00> : vector<8x16xf32>
    %42 = tpu.matmul %39, %0, %cst_49 {dimension_numbers = #tpu.dot_dimension_numbers<[1], [0], [0], [1], [0, 0, 1, 1], [], []>} : vector<8x16xf32>, vector<16x16xf32>, vector<8x16xf32> -> vector<8x16xf32>
    %cst_50 = arith.constant dense<0.000000e+00> : vector<8x16xf32>
    %43 = tpu.matmul %39, %1, %cst_50 {dimension_numbers = #tpu.dot_dimension_numbers<[1], [0], [0], [1], [0, 0, 1, 1], [], []>} : vector<8x16xf32>, vector<16x16xf32>, vector<8x16xf32> -> vector<8x16xf32>
    %cst_51 = arith.constant 0.000000e+00 : f32
    %44 = vector.broadcast %cst_51 : f32 to vector<8x16xf32>
    %45 = arith.subf %44, %43 : vector<8x16xf32>
    %cst_52 = arith.constant dense<0.000000e+00> : vector<8x16xf32>
    %46 = tpu.matmul %41, %0, %cst_52 {dimension_numbers = #tpu.dot_dimension_numbers<[1], [0], [0], [1], [0, 0, 1, 1], [], []>} : vector<8x16xf32>, vector<16x16xf32>, vector<8x16xf32> -> vector<8x16xf32>
    %cst_53 = arith.constant dense<0.000000e+00> : vector<8x16xf32>
    %47 = tpu.matmul %41, %1, %cst_53 {dimension_numbers = #tpu.dot_dimension_numbers<[1], [0], [0], [1], [0, 0, 1, 1], [], []>} : vector<8x16xf32>, vector<16x16xf32>, vector<8x16xf32> -> vector<8x16xf32>
    %cst_54 = arith.constant 0.000000e+00 : f32
    %48 = vector.broadcast %cst_54 : f32 to vector<8x16xf32>
    %49 = arith.subf %48, %47 : vector<8x16xf32>
    %50 = arith.addf %6, %18 : vector<8x16xf32>
    %51 = arith.addf %50, %30 : vector<8x16xf32>
    %52 = arith.addf %51, %42 : vector<8x16xf32>
    %53 = arith.addf %9, %21 : vector<8x16xf32>
    %54 = arith.addf %53, %33 : vector<8x16xf32>
    %55 = arith.addf %54, %45 : vector<8x16xf32>
    %56 = arith.addf %10, %22 : vector<8x16xf32>
    %57 = arith.addf %56, %34 : vector<8x16xf32>
    %58 = arith.addf %57, %46 : vector<8x16xf32>
    %59 = arith.addf %13, %25 : vector<8x16xf32>
    %60 = arith.addf %59, %37 : vector<8x16xf32>
    %61 = arith.addf %60, %49 : vector<8x16xf32>
    %62 = arith.mulf %52, %58 : vector<8x16xf32>
    %63 = arith.mulf %55, %61 : vector<8x16xf32>
    %64 = arith.addf %62, %63 : vector<8x16xf32>
    %65 = arith.mulf %55, %58 : vector<8x16xf32>
    %66 = arith.mulf %52, %61 : vector<8x16xf32>
    %67 = arith.subf %65, %66 : vector<8x16xf32>
    %cst_55 = arith.constant dense<0.000000e+00> : vector<8x16xf32>
    %68 = tpu.matmul %64, %0, %cst_55 {dimension_numbers = #tpu.dot_dimension_numbers<[1], [0], [0], [1], [0, 0, 1, 1], [], []>} : vector<8x16xf32>, vector<16x16xf32>, vector<8x16xf32> -> vector<8x16xf32>
    %cst_56 = arith.constant dense<0.000000e+00> : vector<8x16xf32>
    %69 = tpu.matmul %67, %1, %cst_56 {dimension_numbers = #tpu.dot_dimension_numbers<[1], [0], [0], [1], [0, 0, 1, 1], [], []>} : vector<8x16xf32>, vector<16x16xf32>, vector<8x16xf32> -> vector<8x16xf32>
    %70 = arith.subf %68, %69 : vector<8x16xf32>
    %cst_57 = arith.constant 0.000000e+00 : f32
    %71 = vector.broadcast %cst_57 : f32 to vector<8x16xf32>
    %72 = arith.subf %71, %30 : vector<8x16xf32>
    %73 = arith.addf %6, %72 : vector<8x16xf32>
    %74 = arith.addf %73, %21 : vector<8x16xf32>
    %cst_58 = arith.constant 0.000000e+00 : f32
    %75 = vector.broadcast %cst_58 : f32 to vector<8x16xf32>
    %76 = arith.subf %75, %45 : vector<8x16xf32>
    %77 = arith.addf %74, %76 : vector<8x16xf32>
    %cst_59 = arith.constant 0.000000e+00 : f32
    %78 = vector.broadcast %cst_59 : f32 to vector<8x16xf32>
    %79 = arith.subf %78, %33 : vector<8x16xf32>
    %80 = arith.addf %9, %79 : vector<8x16xf32>
    %cst_60 = arith.constant 0.000000e+00 : f32
    %81 = vector.broadcast %cst_60 : f32 to vector<8x16xf32>
    %82 = arith.subf %81, %18 : vector<8x16xf32>
    %83 = arith.addf %80, %82 : vector<8x16xf32>
    %84 = arith.addf %83, %42 : vector<8x16xf32>
    %cst_61 = arith.constant 0.000000e+00 : f32
    %85 = vector.broadcast %cst_61 : f32 to vector<8x16xf32>
    %86 = arith.subf %85, %34 : vector<8x16xf32>
    %87 = arith.addf %10, %86 : vector<8x16xf32>
    %88 = arith.addf %87, %25 : vector<8x16xf32>
    %cst_62 = arith.constant 0.000000e+00 : f32
    %89 = vector.broadcast %cst_62 : f32 to vector<8x16xf32>
    %90 = arith.subf %89, %49 : vector<8x16xf32>
    %91 = arith.addf %88, %90 : vector<8x16xf32>
    %cst_63 = arith.constant 0.000000e+00 : f32
    %92 = vector.broadcast %cst_63 : f32 to vector<8x16xf32>
    %93 = arith.subf %92, %37 : vector<8x16xf32>
    %94 = arith.addf %13, %93 : vector<8x16xf32>
    %cst_64 = arith.constant 0.000000e+00 : f32
    %95 = vector.broadcast %cst_64 : f32 to vector<8x16xf32>
    %96 = arith.subf %95, %22 : vector<8x16xf32>
    %97 = arith.addf %94, %96 : vector<8x16xf32>
    %98 = arith.addf %97, %46 : vector<8x16xf32>
    %99 = arith.mulf %77, %91 : vector<8x16xf32>
    %100 = arith.mulf %84, %98 : vector<8x16xf32>
    %101 = arith.addf %99, %100 : vector<8x16xf32>
    %102 = arith.mulf %84, %91 : vector<8x16xf32>
    %103 = arith.mulf %77, %98 : vector<8x16xf32>
    %104 = arith.subf %102, %103 : vector<8x16xf32>
    %cst_65 = arith.constant dense<0.000000e+00> : vector<8x16xf32>
    %105 = tpu.matmul %101, %0, %cst_65 {dimension_numbers = #tpu.dot_dimension_numbers<[1], [0], [0], [1], [0, 0, 1, 1], [], []>} : vector<8x16xf32>, vector<16x16xf32>, vector<8x16xf32> -> vector<8x16xf32>
    %cst_66 = arith.constant dense<0.000000e+00> : vector<8x16xf32>
    %106 = tpu.matmul %104, %1, %cst_66 {dimension_numbers = #tpu.dot_dimension_numbers<[1], [0], [0], [1], [0, 0, 1, 1], [], []>} : vector<8x16xf32>, vector<16x16xf32>, vector<8x16xf32> -> vector<8x16xf32>
    %107 = arith.subf %105, %106 : vector<8x16xf32>
    %cst_67 = arith.constant dense<0.000000e+00> : vector<8x16xf32>
    %108 = tpu.matmul %101, %1, %cst_67 {dimension_numbers = #tpu.dot_dimension_numbers<[1], [0], [0], [1], [0, 0, 1, 1], [], []>} : vector<8x16xf32>, vector<16x16xf32>, vector<8x16xf32> -> vector<8x16xf32>
    %cst_68 = arith.constant dense<0.000000e+00> : vector<8x16xf32>
    %109 = tpu.matmul %104, %0, %cst_68 {dimension_numbers = #tpu.dot_dimension_numbers<[1], [0], [0], [1], [0, 0, 1, 1], [], []>} : vector<8x16xf32>, vector<16x16xf32>, vector<8x16xf32> -> vector<8x16xf32>
    %110 = arith.addf %108, %109 : vector<8x16xf32>
    %cst_69 = arith.constant 0.000000e+00 : f32
    %111 = vector.broadcast %cst_69 : f32 to vector<8x16xf32>
    %112 = arith.subf %111, %18 : vector<8x16xf32>
    %113 = arith.addf %6, %112 : vector<8x16xf32>
    %114 = arith.addf %113, %30 : vector<8x16xf32>
    %cst_70 = arith.constant 0.000000e+00 : f32
    %115 = vector.broadcast %cst_70 : f32 to vector<8x16xf32>
    %116 = arith.subf %115, %42 : vector<8x16xf32>
    %117 = arith.addf %114, %116 : vector<8x16xf32>
    %cst_71 = arith.constant 0.000000e+00 : f32
    %118 = vector.broadcast %cst_71 : f32 to vector<8x16xf32>
    %119 = arith.subf %118, %21 : vector<8x16xf32>
    %120 = arith.addf %9, %119 : vector<8x16xf32>
    %121 = arith.addf %120, %33 : vector<8x16xf32>
    %cst_72 = arith.constant 0.000000e+00 : f32
    %122 = vector.broadcast %cst_72 : f32 to vector<8x16xf32>
    %123 = arith.subf %122, %45 : vector<8x16xf32>
    %124 = arith.addf %121, %123 : vector<8x16xf32>
    %cst_73 = arith.constant 0.000000e+00 : f32
    %125 = vector.broadcast %cst_73 : f32 to vector<8x16xf32>
    %126 = arith.subf %125, %22 : vector<8x16xf32>
    %127 = arith.addf %10, %126 : vector<8x16xf32>
    %128 = arith.addf %127, %34 : vector<8x16xf32>
    %cst_74 = arith.constant 0.000000e+00 : f32
    %129 = vector.broadcast %cst_74 : f32 to vector<8x16xf32>
    %130 = arith.subf %129, %46 : vector<8x16xf32>
    %131 = arith.addf %128, %130 : vector<8x16xf32>
    %cst_75 = arith.constant 0.000000e+00 : f32
    %132 = vector.broadcast %cst_75 : f32 to vector<8x16xf32>
    %133 = arith.subf %132, %25 : vector<8x16xf32>
    %134 = arith.addf %13, %133 : vector<8x16xf32>
    %135 = arith.addf %134, %37 : vector<8x16xf32>
    %cst_76 = arith.constant 0.000000e+00 : f32
    %136 = vector.broadcast %cst_76 : f32 to vector<8x16xf32>
    %137 = arith.subf %136, %49 : vector<8x16xf32>
    %138 = arith.addf %135, %137 : vector<8x16xf32>
    %139 = arith.mulf %117, %131 : vector<8x16xf32>
    %140 = arith.mulf %124, %138 : vector<8x16xf32>
    %141 = arith.addf %139, %140 : vector<8x16xf32>
    %142 = arith.mulf %124, %131 : vector<8x16xf32>
    %143 = arith.mulf %117, %138 : vector<8x16xf32>
    %144 = arith.subf %142, %143 : vector<8x16xf32>
    %cst_77 = arith.constant dense<0.000000e+00> : vector<8x16xf32>
    %145 = tpu.matmul %141, %0, %cst_77 {dimension_numbers = #tpu.dot_dimension_numbers<[1], [0], [0], [1], [0, 0, 1, 1], [], []>} : vector<8x16xf32>, vector<16x16xf32>, vector<8x16xf32> -> vector<8x16xf32>
    %cst_78 = arith.constant dense<0.000000e+00> : vector<8x16xf32>
    %146 = tpu.matmul %144, %1, %cst_78 {dimension_numbers = #tpu.dot_dimension_numbers<[1], [0], [0], [1], [0, 0, 1, 1], [], []>} : vector<8x16xf32>, vector<16x16xf32>, vector<8x16xf32> -> vector<8x16xf32>
    %147 = arith.subf %145, %146 : vector<8x16xf32>
    %cst_79 = arith.constant 0.000000e+00 : f32
    %148 = vector.broadcast %cst_79 : f32 to vector<8x16xf32>
    %149 = arith.subf %148, %30 : vector<8x16xf32>
    %150 = arith.addf %6, %149 : vector<8x16xf32>
    %cst_80 = arith.constant 0.000000e+00 : f32
    %151 = vector.broadcast %cst_80 : f32 to vector<8x16xf32>
    %152 = arith.subf %151, %21 : vector<8x16xf32>
    %153 = arith.addf %150, %152 : vector<8x16xf32>
    %154 = arith.addf %153, %45 : vector<8x16xf32>
    %cst_81 = arith.constant 0.000000e+00 : f32
    %155 = vector.broadcast %cst_81 : f32 to vector<8x16xf32>
    %156 = arith.subf %155, %33 : vector<8x16xf32>
    %157 = arith.addf %9, %156 : vector<8x16xf32>
    %158 = arith.addf %157, %18 : vector<8x16xf32>
    %cst_82 = arith.constant 0.000000e+00 : f32
    %159 = vector.broadcast %cst_82 : f32 to vector<8x16xf32>
    %160 = arith.subf %159, %42 : vector<8x16xf32>
    %161 = arith.addf %158, %160 : vector<8x16xf32>
    %cst_83 = arith.constant 0.000000e+00 : f32
    %162 = vector.broadcast %cst_83 : f32 to vector<8x16xf32>
    %163 = arith.subf %162, %34 : vector<8x16xf32>
    %164 = arith.addf %10, %163 : vector<8x16xf32>
    %cst_84 = arith.constant 0.000000e+00 : f32
    %165 = vector.broadcast %cst_84 : f32 to vector<8x16xf32>
    %166 = arith.subf %165, %25 : vector<8x16xf32>
    %167 = arith.addf %164, %166 : vector<8x16xf32>
    %168 = arith.addf %167, %49 : vector<8x16xf32>
    %cst_85 = arith.constant 0.000000e+00 : f32
    %169 = vector.broadcast %cst_85 : f32 to vector<8x16xf32>
    %170 = arith.subf %169, %37 : vector<8x16xf32>
    %171 = arith.addf %13, %170 : vector<8x16xf32>
    %172 = arith.addf %171, %22 : vector<8x16xf32>
    %cst_86 = arith.constant 0.000000e+00 : f32
    %173 = vector.broadcast %cst_86 : f32 to vector<8x16xf32>
    %174 = arith.subf %173, %46 : vector<8x16xf32>
    %175 = arith.addf %172, %174 : vector<8x16xf32>
    %176 = arith.mulf %154, %168 : vector<8x16xf32>
    %177 = arith.mulf %161, %175 : vector<8x16xf32>
    %178 = arith.addf %176, %177 : vector<8x16xf32>
    %179 = arith.mulf %161, %168 : vector<8x16xf32>
    %180 = arith.mulf %154, %175 : vector<8x16xf32>
    %181 = arith.subf %179, %180 : vector<8x16xf32>
    %cst_87 = arith.constant dense<0.000000e+00> : vector<8x16xf32>
    %182 = tpu.matmul %178, %0, %cst_87 {dimension_numbers = #tpu.dot_dimension_numbers<[1], [0], [0], [1], [0, 0, 1, 1], [], []>} : vector<8x16xf32>, vector<16x16xf32>, vector<8x16xf32> -> vector<8x16xf32>
    %cst_88 = arith.constant dense<0.000000e+00> : vector<8x16xf32>
    %183 = tpu.matmul %181, %1, %cst_88 {dimension_numbers = #tpu.dot_dimension_numbers<[1], [0], [0], [1], [0, 0, 1, 1], [], []>} : vector<8x16xf32>, vector<16x16xf32>, vector<8x16xf32> -> vector<8x16xf32>
    %184 = arith.subf %182, %183 : vector<8x16xf32>
    %cst_89 = arith.constant dense<0.000000e+00> : vector<8x16xf32>
    %185 = tpu.matmul %178, %1, %cst_89 {dimension_numbers = #tpu.dot_dimension_numbers<[1], [0], [0], [1], [0, 0, 1, 1], [], []>} : vector<8x16xf32>, vector<16x16xf32>, vector<8x16xf32> -> vector<8x16xf32>
    %cst_90 = arith.constant dense<0.000000e+00> : vector<8x16xf32>
    %186 = tpu.matmul %181, %0, %cst_90 {dimension_numbers = #tpu.dot_dimension_numbers<[1], [0], [0], [1], [0, 0, 1, 1], [], []>} : vector<8x16xf32>, vector<16x16xf32>, vector<8x16xf32> -> vector<8x16xf32>
    %187 = arith.addf %185, %186 : vector<8x16xf32>
    %188 = arith.addf %70, %107 : vector<8x16xf32>
    %189 = arith.addf %188, %147 : vector<8x16xf32>
    %190 = arith.addf %189, %184 : vector<8x16xf32>
    %cst_91 = arith.constant 0.000000e+00 : f32
    %191 = vector.broadcast %cst_91 : f32 to vector<8x16xf32>
    %192 = arith.subf %191, %147 : vector<8x16xf32>
    %193 = arith.addf %70, %192 : vector<8x16xf32>
    %cst_92 = arith.constant 0.000000e+00 : f32
    %194 = vector.broadcast %cst_92 : f32 to vector<8x16xf32>
    %195 = arith.subf %194, %110 : vector<8x16xf32>
    %196 = arith.addf %193, %195 : vector<8x16xf32>
    %197 = arith.addf %196, %187 : vector<8x16xf32>
    %cst_93 = arith.constant 0.000000e+00 : f32
    %198 = vector.broadcast %cst_93 : f32 to vector<8x16xf32>
    %199 = arith.subf %198, %107 : vector<8x16xf32>
    %200 = arith.addf %70, %199 : vector<8x16xf32>
    %201 = arith.addf %200, %147 : vector<8x16xf32>
    %cst_94 = arith.constant 0.000000e+00 : f32
    %202 = vector.broadcast %cst_94 : f32 to vector<8x16xf32>
    %203 = arith.subf %202, %184 : vector<8x16xf32>
    %204 = arith.addf %201, %203 : vector<8x16xf32>
    %cst_95 = arith.constant 0.000000e+00 : f32
    %205 = vector.broadcast %cst_95 : f32 to vector<8x16xf32>
    %206 = arith.subf %205, %147 : vector<8x16xf32>
    %207 = arith.addf %70, %206 : vector<8x16xf32>
    %208 = arith.addf %207, %110 : vector<8x16xf32>
    %cst_96 = arith.constant 0.000000e+00 : f32
    %209 = vector.broadcast %cst_96 : f32 to vector<8x16xf32>
    %210 = arith.subf %209, %187 : vector<8x16xf32>
    %211 = arith.addf %208, %210 : vector<8x16xf32>
    %212 = tpu.concatenate %190, %197, %204, %211 in 1 : vector<8x16xf32>, vector<8x16xf32>, vector<8x16xf32>, vector<8x16xf32> -> vector<8x64xf32>
    %c0_97 = arith.constant 0 : index
    %c0_98 = arith.constant 0 : index
    %213 = vector.load %arg6[%c0_97, %c0_98] : memref<1x64xf32, #tpu.memory_space<vmem>>, vector<1x64xf32>
    %214 = vector.broadcast %213 : vector<1x64xf32> to vector<8x64xf32>
    %215 = arith.mulf %212, %214 : vector<8x64xf32>
    %c0_99 = arith.constant 0 : index
    %c0_100 = arith.constant 0 : index
    %c0_101 = arith.constant 0 : index
    %216 = vector.load %arg7[%c0_99, %c0_100, %c0_101] : memref<1x8x64xf32, #tpu.memory_space<vmem>>, vector<1x8x64xf32>
    %217 = vector.shape_cast %216 : vector<1x8x64xf32> to vector<8x64xf32>
    %218 = vector.shape_cast %215 : vector<8x64xf32> to vector<1x8x64xf32>
    tpu.vector_store %arg7[%c0_99, %c0_100, %c0_101], %218 {strides = array<i32>} : memref<1x8x64xf32, #tpu.memory_space<vmem>>, vector<1x8x64xf32>,
    return
  }
  func.func @transform_0(%arg0: i32, %arg1: i32) -> (i32, i32, i32, i32) {
    %c0_i32 = arith.constant 0 : i32
    %c0_i32_0 = arith.constant 0 : i32
    %c0_i32_1 = arith.constant 0 : i32
    return %arg0, %arg1, %c0_i32, %c0_i32_0 : i32, i32, i32, i32
  }
  func.func @transform_1(%arg0: i32, %arg1: i32) -> (i32, i32, i32, i32) {
    %c0_i32 = arith.constant 0 : i32
    %c0_i32_0 = arith.constant 0 : i32
    %c0_i32_1 = arith.constant 0 : i32
    return %arg0, %arg1, %c0_i32, %c0_i32_0 : i32, i32, i32, i32
  }
  func.func @transform_2(%arg0: i32, %arg1: i32) -> (i32, i32) {
    %c0_i32 = arith.constant 0 : i32
    %c0_i32_0 = arith.constant 0 : i32
    %c0_i32_1 = arith.constant 0 : i32
    return %c0_i32, %c0_i32_0 : i32, i32
  }
  func.func @transform_3(%arg0: i32, %arg1: i32) -> (i32, i32) {
    %c0_i32 = arith.constant 0 : i32
    %c0_i32_0 = arith.constant 0 : i32
    %c0_i32_1 = arith.constant 0 : i32
    return %c0_i32, %c0_i32_0 : i32, i32
  }
  func.func @transform_4(%arg0: i32, %arg1: i32) -> (i32, i32) {
    %c0_i32 = arith.constant 0 : i32
    %c0_i32_0 = arith.constant 0 : i32
    %c0_i32_1 = arith.constant 0 : i32
    return %c0_i32, %c0_i32_0 : i32, i32
  }
  func.func @transform_5(%arg0: i32, %arg1: i32) -> (i32, i32, i32) {
    %c0_i32 = arith.constant 0 : i32
    %c0_i32_0 = arith.constant 0 : i32
    return %arg0, %arg1, %c0_i32 : i32, i32, i32
  }
}

</mosaic_0001>

<bundles_post_ra>
// kernel: tpu_custom_call.1
= control target key start
LH: loop header
LB: loop body
LE: loop exit
PB: predicated region body
PF: predicated region fallthrough
CT: control target
= control target key end

     0   :  { %s4170_s0 = inlined_call_operand.hbm [shape: f32[2,8,4,16], index: 0, kind: input, shape index: {}]   ;;  %s4171_s1 = inlined_call_operand.hbm [shape: f32[2,8,4,16], index: 1, kind: input, shape index: {}]   ;;  %s4172_s2 = inlined_call_operand.hbm [shape: f32[16,16], index: 2, kind: input, shape index: {}]   ;;  %s4173_s3 = inlined_call_operand.hbm [shape: f32[16,16], index: 3, kind: input, shape index: {}]   ;;  %s4174_s4 = inlined_call_operand.vmem [shape: f32[1,64], index: 4, kind: input, shape index: {}]   ;;  %s4175_s5 = inlined_call_operand.hbm [shape: f32[2,8,64], index: 5, kind: output, shape index: {}]  }
   0x1   :  { %4179 = sst [smem:[#allocation19_spill]] %s4170_s0 }
   0x2   :  { %4180 = sst [smem:[#allocation20_spill]] %s4172_s2 }
   0x3   :  { %4181 = sst [smem:[#allocation21_spill]] %s4173_s3 }
   0x4   :  { %10 = vsyncpa [#allocation3], 0 }
   0x5   :  { %12 = vsyncpa [#allocation3 + $0x1], 0 }
   0x6   :  { %13 = vsyncpa [#allocation6], 0 }
   0x7   :  { %15 = vsyncpa [#allocation6 + $0x1], 0 }
   0x8   :  { %16 = vsyncpa [#allocation9], 0 }
   0x9   :  { %17 = vsyncpa [#allocation4], 0 }
   0xa   :  { %19 = vsyncpa [#allocation4 + $0x1], 0  ;;  %s3541_s18 = smov 0   ;;  %s3543_s19 = smov 0  }
   0xb   :  { %s3545_s20 = smov 0   ;;  %s3547_s21 = smov 0  }
   0xc   :  { %s3549_s22 = smov 0   ;;  %s3551_s23 = smov 0  }
   0xd LB: > { %4182 = sst [smem:[#allocation16_spill]] %s3483_s20  ;;  %s3572_s24 = sadd.s32 4294967295, %s3495_s23   ;;  %s3495_s23 = sphi %s3551_s23, %s25_s23   ;;  %s3491_s22 = sphi %s3549_s22, %s4207_s22   ;;  %s3487_s21 = sphi %s3547_s21, %s4206_s21   ;;  %s3483_s20 = sphi %s3545_s20, %s4202_s20   ;;  %s3479_s19 = sphi %s3543_s19, %s4205_s19   ;;  %s3475_s18 = sphi %s3541_s18, %s4204_s18  }
   0xe   : > { %s2866_s25 = sadd.s32 4294967294, %s3495_s23   ;;  %p59_p0 = scmp.ne.s32.totalorder %s3479_s19, %s3475_s18 }
   0xf   : > { %p4176_p1 = scmp.eq.s32.totalorder %s3572_s24, 0  ;;  %p182_p3 = scmp.eq.s32.totalorder %s2866_s25, 1 }
  0x10   : > { %p2867_p5 = scmp.ge.s32.totalorder %s3495_s23, 1  ;;  %p189_p7 = scmp.lt.s32.totalorder %s3495_s23, 3 }
  0x11   : > { %p3581_p4 = por %p4176_p1, %p59_p0  ;;  %p3586_p6 = por %p182_p3, %p59_p0 }
  0x12   : > { %p3591_p8 = pnand %p2867_p5, %p189_p7  ;;  %s3497_s29 = smov [#allocation7]  }
  0x13   : > { %s4184_s27 = scalar_select %p3586_p6, 1, 0 }
  0x14   : > { %s201_s30 = sshll.u32 %s3497_s29, 4  ;;  %p3212_p9 = pneg %p3591_p8  ;;  %s202_s30 = int_to_ptr.vmem [resolvable:$true] %s201_s30 }
  0x15   : > { %s3498_s7 = smov [#allocation8]   ;;  %s3306_s9 = scalar_lea.vmem %s202_s30, 256 }
  0x16   : > { %p3600_p11 = pnand %p3212_p9, %p4176_p1  ;;  %s214_s8 = sshll.u32 %s3498_s7, 4  ;;  %s215_s8 = int_to_ptr.vmem [resolvable:$true] %s214_s8 }
  0x17   : > { %p3307_p13 = scmp.ne.s32.totalorder %s202_s30, %s3306_s9  ;;  %p3314_p5 = scmp.lt.s32.totalorder %s202_s30, %s202_s30 }
  0x18   : > { %p3297_p12 = pneg %p3600_p11  ;;  %p3315_p7 = scmp.lt.s32.totalorder %s3306_s9, %s3306_s9 }
  0x1a   : > { %p3309_p0 = pnand %p3307_p13, %p3297_p12  ;;  %p3316_p10 = por %p3315_p7, %p3314_p5 }
  0x1c   : > { %p3310_p3 = pneg %p3309_p0 }
  0x1e   : > { %p3317_p9 = pnand %p3316_p10, %p3310_p3 }
  0x20   : > { %3320 = shalt.err (!%p3317_p9)
}
  0x21   : > { %s3499_s10 = smov 128   ;;  %s3500_s11 = smov 8  }
  0x22   : > { %s4187_s2 = sld [smem:[#allocation20_spill]]  ;;  %s3332_s14 = scalar_lea.vmem %s215_s8, 256 }
  0x23   : > { %p3333_p1 = scmp.ne.s32.totalorder %s215_s8, %s3332_s14  ;;  %p3340_p2 = scmp.lt.s32.totalorder %s215_s8, %s215_s8 }
  0x24   : > { %p3341_p6 = scmp.lt.s32.totalorder %s3332_s14, %s3332_s14 }
  0x25   : > { %p3335_p13 = pnand %p3333_p1, %p3297_p12 }
  0x26   : > { %p3342_p5 = por %p3341_p6, %p3340_p2 }
  0x27   : > { %p3336_p0 = pneg %p3335_p13 }
  0x28   : > { %3215 = dma.hbm_to_vmem [thread:$0]  (!%p3600_p11), %s4187_s2, 256, %s202_s30, [#allocation6], %s3499_s10, %s3499_s10, %s3500_s11  }
  0x29   : > { %p3343_p10 = pnand %p3342_p5, %p3336_p0 }
  0x2b   : > { %3346 = shalt.err (!%p3343_p10)
}
  0x2c   : > { %s4188_s3 = sld [smem:[#allocation21_spill]]  ;;  %s37_s17 = sadd.s32 1, %s3491_s22 }
  0x2d   : > { %s46_s25 = sadd.s32 1, %s3483_s20  ;;  %p39_p1 = scmp.ge.s32.totalorder %s37_s17, 2 }
  0x2e   : > { %p53_p2 = scmp.ne.s32.totalorder %s3483_s20, %s3479_s19  ;;  %p54_p6 = scmp.eq.s32.totalorder %s3495_s23, 0 }
  0x2f   : > { %p3232_p12 = scmp.lt.s32.totalorder %s3495_s23, 2  ;;  %s4209_s17 = smov (%p39_p1, %s37_s17), 0 }
  0x30   : > { %4189 = sst [smem:[#allocation17_spill]] %s4209_s17  ;;  %p55_p3 = por %p54_p6, %p53_p2 }
  0x31   : > { %p4190_p7 = scmp.eq.s32.totalorder %s3572_s24, 1  ;;  %s41_s30 = ssub.s32 %s3491_s22, %s4209_s17 }
  0x32   : > { %3218 = dma.hbm_to_vmem [thread:$0]  (!%p3600_p11), %s4188_s3, 256, %s215_s8, [#allocation9], %s3499_s10, %s3499_s10, %s3500_s11  }
  0x33   : > { %p3632_p9 = por %p4190_p7, %p53_p2  ;;  %s231_s6 = sand.u32 1, %s3483_s20  }
  0x34   : > { %p44_p11 = scmp.eq.s32.totalorder %s41_s30, 0  ;;  %s3639_s7 = sshll.u32 %s231_s6, 5 }
  0x35   : > { %s2916_s8 = sshll.u32 %s3491_s22, 9  ;;  %s4193_s0 = sld [smem:[#allocation19_spill]] }
  0x36   : > { %s3643_s9 = scalar_select %p44_p11, %s3483_s20, %s46_s25  }
  0x37   : > { %s235_s13 = scalar_lea.vmem [#allocation2], %s3639_s7  ;;  %p3653_p13 = pnand %p3232_p12, %p55_p3 }
  0x38   : > { %4192 = sst [smem:[#allocation18_spill]] %s3643_s9  ;;  %s244_s14 = sshll.u32 %s235_s13, 4  ;;  %s245_s14 = int_to_ptr.vmem [resolvable:$true] %s244_s14 }
  0x39   : > { %s232_s16 = scalar_lea.sflag [#allocation3], %s231_s6  ;;  %p3349_p0 = pneg %p3653_p13 }
  0x3a   : > { %s3360_s25 = scalar_lea.vmem %s245_s14, 512  ;;  %s3501_s30 = smov [#allocation2]  }
  0x3b   : > { %s243_s12 = scalar_lea.hbm %s4193_s0, %s2916_s8  ;;  %p3361_p5 = scmp.ne.s32.totalorder %s245_s14, %s3360_s25 }
  0x3c   : > { %s3365_s10 = sshll.u32 %s3501_s30, 4  ;;  %s3366_s10 = int_to_ptr.vmem [resolvable:$false] %s3365_s10 }
  0x3d   : > { %p3363_p10 = pnand %p3361_p5, %p3349_p0  ;;  %s3367_s11 = scalar_lea.vmem %s3366_s10, 1024 }
  0x3e   : > { %p3368_p2 = scmp.lt.s32.totalorder %s245_s14, %s3366_s10  ;;  %p3369_p6 = scmp.lt.s32.totalorder %s3367_s11, %s3360_s25 }
  0x3f   : > { %p3364_p1 = pneg %p3363_p10 }
  0x40   : > { %p3370_p12 = por %p3369_p6, %p3368_p2 }
  0x42   : > { %p3371_p3 = pnand %p3370_p12, %p3364_p1 }
  0x44   : > { %3374 = shalt.err (!%p3371_p3)
}
  0x45   : > { %s3502_s13 = smov 64   ;;  %s3503_s6 = smov 4  }
  0x46   : > { %3222 = dma.hbm_to_vmem [thread:$0]  (!%p3653_p13), %s243_s12, 512, %s245_s14, %s232_s16, %s3502_s13, %s3502_s13, %s3503_s6  }
  0x47   : > { %s266_s30 = scalar_lea.hbm %s4171_s1, %s2916_s8  ;;  %s258_s3 = scalar_lea.vmem [#allocation5], %s3639_s7 }
  0x48   : > { %s267_s10 = sshll.u32 %s258_s3, 4  ;;  %s254_s25 = sand.u32 1, %s3495_s23   ;;  %s268_s10 = int_to_ptr.vmem [resolvable:$true] %s267_s10 }
  0x49   : > { %s255_s11 = scalar_lea.sflag [#allocation6], %s254_s25  ;;  %s3388_s17 = scalar_lea.vmem %s268_s10, 512 }
  0x4a   : > { %p3389_p7 = scmp.ne.s32.totalorder %s268_s10, %s3388_s17  ;;  %s3504_s9 = smov [#allocation5]  }
  0x4b   : > { %s3393_s20 = sshll.u32 %s3504_s9, 4  ;;  %s3394_s20 = int_to_ptr.vmem [resolvable:$false] %s3393_s20 }
  0x4c   : > { %p3391_p11 = pnand %p3389_p7, %p3349_p0  ;;  %s3395_s12 = scalar_lea.vmem %s3394_s20, 1024 }
  0x4d   : > { %p3396_p10 = scmp.lt.s32.totalorder %s268_s10, %s3394_s20  ;;  %p3397_p1 = scmp.lt.s32.totalorder %s3395_s12, %s3388_s17 }
  0x4e   : > { %p3392_p5 = pneg %p3391_p11 }
  0x4f   : > { %p3398_p2 = por %p3397_p1, %p3396_p10 }
  0x51   : > { %p3399_p6 = pnand %p3398_p2, %p3392_p5 }
  0x53   : > { %3402 = shalt.err (!%p3399_p6)
}
  0x54   : > { %3225 = dma.hbm_to_vmem [thread:$0]  (!%p3653_p13), %s266_s30, 512, %s268_s10, %s255_s11, %s3502_s13, %s3502_s13, %s3503_s6  }
  0x55   : > { %279 = sbr.rel (%p3591_p8) target bundleno = 718 (0x2ce), region = 40  ;;  %s3679_s0 = sand.u32 (!%p3591_p8), 1, %s3479_s19  }
  0x56   : > { %s2878_s2 = sshll.u32 (!%p3591_p8), %s3679_s0, 5  ;;  %s282_s3 = scalar_lea.sflag (!%p3591_p8), [#allocation3], %s3679_s0 }
  0x57   : > { %s3683_s7 = scalar_lea.vmem (!%p3591_p8), [#allocation2], %s2878_s2 }
  0x5a   : > { %3454 = dma.done.wait (%p3581_p4), %s282_s3, 512  }
  0x5b   : > { %3456 = vsyncadd (%p3581_p4), %s282_s3, 4294966784  ;;  %s290_s20 = sand.u32 1, %s3572_s24   ;;  %s3690_s17 = scalar_lea.vmem [#allocation5], %s2878_s2 }
  0x5c   : > { %s291_s28 = scalar_lea.sflag [#allocation6], %s290_s20 }
  0x5d   : > { %3458 = dma.done.wait (%p3581_p4), %s291_s28, 512  }
  0x5e   : > { %3460 = vsyncadd (%p3581_p4), %s291_s28, 4294966784  ;;  %p4195_p8 = scmp.eq.s32.totalorder %s3572_s24, 0 }
  0x60   : > { %3462 = dma.done.wait (%p4195_p8), [#allocation6], 256   ;;  %p4196_p13 = pmov %p4195_p8 }
  0x61   : > { %p4197_p0 = pmov %p4195_p8 }
  0x62   : > { %3464 = vsyncadd (%p4196_p13), [#allocation6], 4294967040 }
  0x63   : > { %3466 = dma.done.wait (%p4197_p0), [#allocation9], 256   ;;  %p4198_p12 = pmov %p4197_p0 }
  0x64   : > { %v3505_v0 = vmov 0.0   ;;  %vm3506_vm0 = vmmov 0   ;;  %vm365_vm1 = vcmask 1041409   ;;  %vm368_vm2 = vcmask 1042434   ;;  %v3710_v1 = vld [vmem:[#allocation8 + $0x8] sm:$0xff]  ;;  %v3712_v2 = vld [vmem:[#allocation7 + $0x8] sm:$0xff] }
  0x65   : > { %3468 = vsyncadd (%p4198_p12), [#allocation9], 4294967040  ;;  %3009 = vmatprep.subr.mxu1 %v3505_v0  ;;  %3002 = vmatprep.subr.mxu0 %v3505_v0  ;;  %vm371_vm3 = vcmask 1043459   ;;  %v3714_v3 = vld [vmem:[#allocation8] sm:$0xff]  ;;  %vm374_vm4 = vcmask 1044484   ;;  %vm377_vm5 = vcmask 1045509  }
  0x66   : > { %3006 = vmatprep.mubr.msk.f32.mxu0 %vm3506_vm0, %v3505_v0  ;;  %3013 = vmatprep.mubr.msk.f32.mxu1 %vm3506_vm0, %v3505_v0  ;;  %vm380_vm6 = vcmask 1046534   ;;  %v3718_v4 = vld [vmem:[#allocation7] sm:$0xff]  ;;  %vm383_vm7 = vcmask 1047559   ;;  %v342_v7 = vld [vmem:[%s3683_s7 + $0x8] sm:$0x1]  ;;  %vm385_vm8 = vcmask 130048  }
  0x67   : > { %3010 = vmatpush3.msra.mxu1 %v3710_v1  ;;  %3003 = vmatpush3.msra.mxu0 %v3712_v2  ;;  %v340_v5 = vld [vmem:[%s3683_s7] sm:$0x1]  ;;  %v341_v6 = vld [vmem:[%s3683_s7 + $0x4] sm:$0x1]  ;;  %v343_v8 = vld [vmem:[%s3683_s7 + $0xc] sm:$0x1] }
  0x68   : > { %3011 = vmatprep.subr.mxu1 %v3505_v0  ;;  %3004 = vmatprep.subr.mxu0 %v3505_v0  ;;  %v344_v9 = vld [vmem:[%s3683_s7 + $0x10] sm:$0x1]  ;;  %v345_v10 = vld [vmem:[%s3683_s7 + $0x14] sm:$0x1]  ;;  %v346_v11 = vld [vmem:[%s3683_s7 + $0x18] sm:$0x1] }
  0x69   : > { %3012 = vmatpush3.msra.mxu1 %v3714_v3  ;;  %3005 = vmatpush3.msra.mxu0 %v3718_v4  ;;  %v347_v12 = vld [vmem:[%s3683_s7 + $0x1c] sm:$0x1]  ;;  %v364_v13 = vrot.slane %v341_v6, 7  ;;  %v367_v14 = vrot.slane %v342_v7, 6  ;;  %v370_v15 = vrot.slane %v343_v8, 5  ;;  %v373_v16 = vrot.slane %v344_v9, 4 }
  0x6a   : > { %3023 = vmatprep.subr.mxu1 %v3505_v0  ;;  %3016 = vmatprep.subr.mxu0 %v3505_v0  ;;  %v376_v17 = vrot.slane %v345_v10, 3  ;;  %v379_v18 = vrot.slane %v346_v11, 2  ;;  %v382_v19 = vrot.slane %v347_v12, 1  ;;  %v348_v20 = vld [vmem:[%s3690_s17] sm:$0x1]  ;;  %s3507_s24 = smov 16  }
  0x6b   : > { %v349_v21 = vld [vmem:[%s3690_s17 + $0x4] sm:$0x1]  ;;  %v366_v22 = vsel %vm365_vm1, %v364_v13, %v340_v5  ;;  %v350_v23 = vld [vmem:[%s3690_s17 + $0x8] sm:$0x1]  ;;  %v351_v24 = vld [vmem:[%s3690_s17 + $0xc] sm:$0x1] }
  0x6c   : > { %v352_v25 = vld [vmem:[%s3690_s17 + $0x10] sm:$0x1]  ;;  %v369_v26 = vsel %vm368_vm2, %v367_v14, %v366_v22  ;;  %v353_v27 = vld [vmem:[%s3690_s17 + $0x14] sm:$0x1]  ;;  %v354_v28 = vld [vmem:[%s3690_s17 + $0x18] sm:$0x1] }
  0x6d   : > { %v355_v29 = vld [vmem:[%s3690_s17 + $0x1c] sm:$0x1]  ;;  %v372_v30 = vsel %vm371_vm3, %v370_v15, %v369_v26  ;;  %v537_v31 = vrot.slane %v349_v21, 7  ;;  %v539_v32 = vrot.slane %v350_v23, 6  ;;  %v541_v33 = vrot.slane %v351_v24, 5  ;;  %s3508_s26 = smov 48  }
  0x6e   : > { %v694_v34 = vld [vmem:[%s3683_s7 + $0x1] sm:$0x1]  ;;  %v375_v35 = vsel %vm374_vm4, %v373_v16, %v372_v30  ;;  %v543_v36 = vrot.slane %v352_v25, 4  ;;  %v545_v37 = vrot.slane %v353_v27, 3  ;;  %v547_v38 = vrot.slane %v354_v28, 2  ;;  %s3509_s8 = smov 32  }
  0x6f   : > { %v695_v39 = vld [vmem:[%s3683_s7 + $0x5] sm:$0x1]  ;;  %v378_v40 = vsel %vm377_vm5, %v376_v17, %v375_v35  ;;  %v538_v41 = vsel %vm365_vm1, %v537_v31, %v348_v20  ;;  %v549_v42 = vrot.slane %v355_v29, 1  ;;  %v696_v43 = vld [vmem:[%s3683_s7 + $0x9] sm:$0x1]  ;;  %s2882_s9 = sshll.u32 %s3679_s0, 3 }
  0x70   : > { %v697_v44 = vld [vmem:[%s3683_s7 + $0xd] sm:$0x1]  ;;  %v718_v45 = vrot.slane %v695_v39, 7  ;;  %v381_v46 = vsel %vm380_vm6, %v379_v18, %v378_v40  ;;  %v540_v47 = vsel %vm368_vm2, %v539_v32, %v538_v41  ;;  %v698_v48 = vld [vmem:[%s3683_s7 + $0x11] sm:$0x1]  ;;  %v720_v55 = vrot.slane %v696_v43, 6 }
  0x71   : > { %v699_v49 = vld [vmem:[%s3683_s7 + $0x15] sm:$0x1]  ;;  %v700_v50 = vld [vmem:[%s3683_s7 + $0x19] sm:$0x1]  ;;  %v384_v51 = vsel %vm383_vm7, %v382_v19, %v381_v46  ;;  %v542_v52 = vsel %vm371_vm3, %v541_v33, %v540_v47  ;;  %v3760_v53 = vld [vmem:[%s3683_s7 + $0x1d] sm:$0x1] }
  0x72   : > { %v719_v54 = vsel %vm365_vm1, %v718_v45, %v694_v34  ;;  %3007 = vmatmul.mubr.msk.f32.vlgmr.msra.gmra.mxu0 %vm385_vm8, %v384_v51  ;;  %3014 = vmatmul.mubr.msk.f32.vlgmr.msra.gmra.mxu1 %vm385_vm8, %v384_v51  ;;  %v544_v56 = vsel %vm374_vm4, %v543_v36, %v542_v52  ;;  %v722_v57 = vrot.slane %v697_v44, 5  ;;  %v724_v58 = vrot.slane %v698_v48, 4  ;;  %v702_v60 = vld [vmem:[%s3690_s17 + $0x1] sm:$0x1]  ;;  %v703_v61 = vld [vmem:[%s3690_s17 + $0x5] sm:$0x1] }
  0x73   : > { %v726_v59 = vrot.slane %v699_v49, 3  ;;  %3024 = vmatpush3.msra.mxu1 %v3710_v1  ;;  %3017 = vmatpush3.msra.mxu0 %v3712_v2  ;;  %v546_v62 = vsel %vm377_vm5, %v545_v37, %v544_v56  ;;  %v721_v63 = vsel %vm368_vm2, %v720_v55, %v719_v54  ;;  %v728_v5 = vrot.slane %v700_v50, 2  ;;  %v704_v6 = vld [vmem:[%s3690_s17 + $0x9] sm:$0x1]  ;;  %v705_v7 = vld [vmem:[%s3690_s17 + $0xd] sm:$0x1] }
  0x74   : > { %3025 = vmatprep.subr.mxu1 %v3505_v0  ;;  %3018 = vmatprep.subr.mxu0 %v3505_v0  ;;  %v548_v8 = vsel %vm380_vm6, %v547_v38, %v546_v62  ;;  %v723_v9 = vsel %vm371_vm3, %v722_v57, %v721_v63  ;;  %v730_v10 = vrot.slane %v3760_v53, 1  ;;  %v706_v11 = vld [vmem:[%s3690_s17 + $0x11] sm:$0x1]  ;;  %v707_v12 = vld [vmem:[%s3690_s17 + $0x15] sm:$0x1]  ;;  %v883_v16 = vrot.slane %v703_v61, 7 }
  0x75   : > { %3026 = vmatpush3.msra.mxu1 %v3714_v3  ;;  %3019 = vmatpush3.msra.mxu0 %v3718_v4  ;;  %v550_v13 = vsel %vm383_vm7, %v549_v42, %v548_v8  ;;  %v725_v14 = vsel %vm374_vm4, %v724_v58, %v723_v9  ;;  %v708_v15 = vld [vmem:[%s3690_s17 + $0x19] sm:$0x1]  ;;  %v885_v17 = vrot.slane %v704_v6, 6  ;;  %v3792_v19 = vld [vmem:[%s3690_s17 + $0x1d] sm:$0x1]  ;;  %v887_v20 = vrot.slane %v705_v7, 5 }
  0x76   : > { %3020 = vmatprep.mubr.msk.f32.mxu0 %vm3506_vm0, %v3505_v0  ;;  %3027 = vmatprep.mubr.msk.f32.mxu1 %vm3506_vm0, %v3505_v0  ;;  %v727_v18 = vsel %vm377_vm5, %v726_v59, %v725_v14  ;;  %v889_v21 = vrot.slane %v706_v11, 4  ;;  %v1040_v22 = vld [vmem:[%s3683_s7 + $0x2] sm:$0x1]  ;;  %v1041_v23 = vld [vmem:[%s3683_s7 + $0x6] sm:$0x1]  ;;  %v884_v25 = vsel %vm365_vm1, %v883_v16, %v702_v60  ;;  %v891_v26 = vrot.slane %v707_v12, 3 }
  0x77   : > { %3037 = vmatprep.subr.mxu1 %v3505_v0  ;;  %3021 = vmatmul.mubr.msk.f32.vlgmr.msra.gmra.mxu0 %vm385_vm8, %v550_v13  ;;  %v729_v24 = vsel %vm380_vm6, %v728_v5, %v727_v18  ;;  %v1042_v27 = vld [vmem:[%s3683_s7 + $0xa] sm:$0x1]  ;;  %v1043_v28 = vld [vmem:[%s3683_s7 + $0xe] sm:$0x1]  ;;  %v886_v29 = vsel %vm368_vm2, %v885_v17, %v884_v25  ;;  %v893_v30 = vrot.slane %v708_v15, 2  ;;  %v1064_v34 = vrot.slane %v1041_v23, 7 }
  0x78   : > { %3028 = vmatmul.mubr.msk.f32.vlgmr.msra.gmra.mxu1 %vm385_vm8, %v550_v13  ;;  %3030 = vmatprep.subr.mxu0 %v3505_v0  ;;  %v1044_v31 = vld [vmem:[%s3683_s7 + $0x12] sm:$0x1]  ;;  %v1045_v32 = vld [vmem:[%s3683_s7 + $0x16] sm:$0x1]  ;;  %v888_v33 = vsel %vm371_vm3, %v887_v20, %v886_v29  ;;  %v1066_v35 = vrot.slane %v1042_v27, 6  ;;  %v1068_v36 = vrot.slane %v1043_v28, 5  ;;  %v731_v37 = vsel %vm383_vm7, %v730_v10, %v729_v24 }
  0x79   : > { %3038 = vmatpush3.msra.mxu1 %v3710_v1  ;;  %3031 = vmatpush3.msra.mxu0 %v3712_v2  ;;  %v890_v38 = vsel %vm374_vm4, %v889_v21, %v888_v33  ;;  %v1046_v39 = vld [vmem:[%s3683_s7 + $0x1a] sm:$0x1]  ;;  %v1070_v40 = vrot.slane %v1044_v31, 4  ;;  %v895_v42 = vrot.slane %v3792_v19, 1  ;;  %v1065_v43 = vsel %vm365_vm1, %v1064_v34, %v1040_v22  ;;  %v1049_v45 = vld [vmem:[%s3690_s17 + $0x6] sm:$0x1] }
  0x7a   : > { %3039 = vmatprep.subr.mxu1 %v3505_v0  ;;  %3032 = vmatprep.subr.mxu0 %v3505_v0  ;;  %v892_v41 = vsel %vm377_vm5, %v891_v26, %v890_v38  ;;  %v1072_v44 = vrot.slane %v1045_v32, 3  ;;  %v1050_v46 = vld [vmem:[%s3690_s17 + $0xa] sm:$0x1]  ;;  %v1067_v47 = vsel %vm368_vm2, %v1066_v35, %v1065_v43  ;;  %v1048_v48 = vld [vmem:[%s3690_s17 + $0x2] sm:$0x1]  ;;  %v1229_v53 = vrot.slane %v1049_v45, 7 }
  0x7b   : > { %3040 = vmatpush3.msra.mxu1 %v3714_v3  ;;  %3033 = vmatpush3.msra.mxu0 %v3718_v4  ;;  %v1051_v49 = vld [vmem:[%s3690_s17 + $0xe] sm:$0x1]  ;;  %v1052_v50 = vld [vmem:[%s3690_s17 + $0x12] sm:$0x1]  ;;  %v894_v51 = vsel %vm380_vm6, %v893_v30, %v892_v41  ;;  %v1069_v52 = vsel %vm371_vm3, %v1068_v36, %v1067_v47  ;;  %v1231_v54 = vrot.slane %v1050_v46, 6  ;;  %v1074_v59 = vrot.slane %v1046_v39, 2 }
  0x7c   : > { %3034 = vmatprep.mubr.msk.f32.mxu0 %vm3506_vm0, %v3505_v0  ;;  %3041 = vmatprep.mubr.msk.f32.mxu1 %vm3506_vm0, %v3505_v0  ;;  %v1047_v55 = vld [vmem:[%s3683_s7 + $0x1e] sm:$0x1]  ;;  %v1071_v56 = vsel %vm374_vm4, %v1070_v40, %v1069_v52  ;;  %v1053_v57 = vld [vmem:[%s3690_s17 + $0x16] sm:$0x1]  ;;  %v1233_v58 = vrot.slane %v1051_v49, 5  ;;  %v1230_v60 = vsel %vm365_vm1, %v1229_v53, %v1048_v48  ;;  %v1235_v61 = vrot.slane %v1052_v50, 4 }
  0x7d   : > { %3051 = vmatprep.subr.mxu1 %v3505_v0  ;;  %3035 = vmatmul.mubr.msk.f32.vlgmr.msra.gmra.mxu0 %vm385_vm8, %v731_v37  ;;  %v1387_v62 = vld [vmem:[%s3683_s7 + $0x7] sm:$0x1]  ;;  %v1388_v63 = vld [vmem:[%s3683_s7 + $0xb] sm:$0x1]  ;;  %v896_v5 = vsel %vm383_vm7, %v895_v42, %v894_v51  ;;  %v1073_v6 = vsel %vm377_vm5, %v1072_v44, %v1071_v56  ;;  %v1232_v7 = vsel %vm368_vm2, %v1231_v54, %v1230_v60  ;;  %v1386_v8 = vld [vmem:[%s3683_s7 + $0x3] sm:$0x1] }
  0x7e   : > { %3042 = vmatmul.mubr.msk.f32.vlgmr.msra.gmra.mxu1 %vm385_vm8, %v731_v37  ;;  %3044 = vmatprep.subr.mxu0 %v3505_v0  ;;  %v1389_v9 = vld [vmem:[%s3683_s7 + $0xf] sm:$0x1]  ;;  %v1076_v10 = vrot.slane %v1047_v55, 1  ;;  %v1234_v11 = vsel %vm371_vm3, %v1233_v58, %v1232_v7  ;;  %v1410_v12 = vrot.slane %v1387_v62, 7  ;;  %v1412_v13 = vrot.slane %v1388_v63, 6  ;;  %s2913_s16 = sshll.u32 %s3487_s21, 7 }
  0x7f   : > { %3052 = vmatpush3.msra.mxu1 %v3710_v1  ;;  %3045 = vmatpush3.msra.mxu0 %v3712_v2  ;;  %v1054_v14 = vld [vmem:[%s3690_s17 + $0x1a] sm:$0x1]  ;;  %v1237_v15 = vrot.slane %v1053_v57, 3  ;;  %v1390_v16 = vld [vmem:[%s3683_s7 + $0x13] sm:$0x1]  ;;  %v1414_v17 = vrot.slane %v1389_v9, 5  ;;  %v1075_v18 = vsel %vm380_vm6, %v1074_v59, %v1073_v6  ;;  %v1236_v19 = vsel %vm374_vm4, %v1235_v61, %v1234_v11  ;;  %s2736_s25 = scalar_lea.hbm %s4175_s5, %s2913_s16 }
  0x80   : > { %3053 = vmatprep.subr.mxu1 %v3505_v0  ;;  %3046 = vmatprep.subr.mxu0 %v3505_v0  ;;  %v1411_v20 = vsel %vm365_vm1, %v1410_v12, %v1386_v8  ;;  %v1395_v21 = vld [vmem:[%s3690_s17 + $0x7] sm:$0x1]  ;;  %v1396_v22 = vld [vmem:[%s3690_s17 + $0xb] sm:$0x1]  ;;  %v1055_v23 = vld [vmem:[%s3690_s17 + $0x1e] sm:$0x1]  ;;  %v1077_v32 = vsel %vm383_vm7, %v1076_v10, %v1075_v18 }
  0x81   : > { %3054 = vmatpush3.msra.mxu1 %v3714_v3  ;;  %3047 = vmatpush3.msra.mxu0 %v3718_v4  ;;  %v1391_v24 = vld [vmem:[%s3683_s7 + $0x17] sm:$0x1]  ;;  %v1413_v25 = vsel %vm368_vm2, %v1412_v13, %v1411_v20  ;;  %v1394_v26 = vld [vmem:[%s3690_s17 + $0x3] sm:$0x1]  ;;  %v1239_v27 = vrot.slane %v1054_v14, 2  ;;  %v1416_v28 = vrot.slane %v1390_v16, 4  ;;  %v1238_v33 = vsel %vm377_vm5, %v1237_v15, %v1236_v19 }
  0x82   : > { %3048 = vmatprep.mubr.msk.f32.mxu0 %vm3506_vm0, %v3505_v0  ;;  %3055 = vmatprep.mubr.msk.f32.mxu1 %vm3506_vm0, %v3505_v0  ;;  %v1397_v29 = vld [vmem:[%s3690_s17 + $0xf] sm:$0x1]  ;;  %v1575_v30 = vrot.slane %v1395_v21, 7  ;;  %v1577_v31 = vrot.slane %v1396_v22, 6  ;;  %v1415_v34 = vsel %vm371_vm3, %v1414_v17, %v1413_v25  ;;  %v1241_v35 = vrot.slane %v1055_v23, 1  ;;  %s333_s13 = scalar_lea.vmem [#allocation10], %s2882_s9 }
  0x83   : > { %3065 = vmatprep.subr.mxu1 %v3505_v0  ;;  %3049 = vmatmul.mubr.msk.f32.vlgmr.msra.gmra.mxu0 %vm385_vm8, %v896_v5  ;;  %v1392_v37 = vld [vmem:[%s3683_s7 + $0x1b] sm:$0x1]  ;;  %v1418_v38 = vrot.slane %v1391_v24, 3  ;;  %v1398_v39 = vld [vmem:[%s3690_s17 + $0x13] sm:$0x1]  ;;  %v1579_v40 = vrot.slane %v1397_v29, 5  ;;  %v1240_v41 = vsel %vm380_vm6, %v1239_v27, %v1238_v33  ;;  %v1417_v42 = vsel %vm374_vm4, %v1416_v28, %v1415_v34 }
  0x84   : > { %3056 = vmatmul.mubr.msk.f32.vlgmr.msra.gmra.mxu1 %vm385_vm8, %v896_v5  ;;  %3058 = vmatprep.subr.mxu0 %v3505_v0  ;;  %v1576_v36 = vsel %vm365_vm1, %v1575_v30, %v1394_v26  ;;  %v1393_v44 = vld [vmem:[%s3683_s7 + $0x1f] sm:$0x1]  ;;  %v1420_v45 = vrot.slane %v1392_v37, 2  ;;  %v1399_v46 = vld [vmem:[%s3690_s17 + $0x17] sm:$0x1]  ;;  %v1581_v47 = vrot.slane %v1398_v39, 4  ;;  %v1242_v48 = vsel %vm383_vm7, %v1241_v35, %v1240_v41 }
  0x85   : > { %3066 = vmatpush3.msra.mxu1 %v3710_v1  ;;  %3059 = vmatpush3.msra.mxu0 %v3712_v2  ;;  %v1578_v43 = vsel %vm368_vm2, %v1577_v31, %v1576_v36  ;;  %v1419_v49 = vsel %vm377_vm5, %v1418_v38, %v1417_v42  ;;  %v1422_v51 = vrot.slane %v1393_v44, 1  ;;  %v1400_v52 = vld [vmem:[%s3690_s17 + $0x1b] sm:$0x1]  ;;  %v1583_v53 = vrot.slane %v1399_v46, 3  ;;  %v1401_v56 = vld [vmem:[%s3690_s17 + $0x1f] sm:$0x1] }
  0x86   : > { %3067 = vmatprep.subr.mxu1 %v3505_v0  ;;  %3060 = vmatprep.subr.mxu0 %v3505_v0  ;;  %v1580_v50 = vsel %vm371_vm3, %v1579_v40, %v1578_v43  ;;  %v1421_v54 = vsel %vm380_vm6, %v1420_v45, %v1419_v49  ;;  %v1585_v57 = vrot.slane %v1400_v52, 2  ;;  %v1587_v60 = vrot.slane %v1401_v56, 1  ;;  %s2738_s6 = sshll.u32 %s333_s13, 4  ;;  %s2724_s11 = scalar_lea.sflag [#allocation4], %s3679_s0  ;;  %s2739_s6 = int_to_ptr.vmem [resolvable:$true] %s2738_s6 }
  0x87   : > { %3068 = vmatpush3.msra.mxu1 %v3714_v3  ;;  %3061 = vmatpush3.msra.mxu0 %v3718_v4  ;;  %v1582_v55 = vsel %vm374_vm4, %v1581_v47, %v1580_v50  ;;  %v1423_v58 = vsel %vm383_vm7, %v1422_v51, %v1421_v54  ;;  %vm2709_vm9 = vcmask 261120   ;;  %vm2711_vm10 = vcmask 392192   ;;  %s3403_s12 = scalar_lea.vmem %s2739_s6, 128  ;;  %s3510_s21 = smov [#allocation10]  }
  0x88   : > { %3062 = vmatprep.mubr.msk.f32.mxu0 %vm3506_vm0, %v3505_v0  ;;  %3069 = vmatprep.mubr.msk.f32.mxu1 %vm3506_vm0, %v3505_v0  ;;  %v1584_v59 = vsel %vm377_vm5, %v1583_v53, %v1582_v55  ;;  %vm2721_vm11 = vcmask 523264   ;;  %p3404_p4 = scmp.ne.s32.totalorder %s2739_s6, %s3403_s12  ;;  %s3407_s2 = sshll.u32 %s3510_s21, 4  ;;  %s3408_s2 = int_to_ptr.vmem [resolvable:$false] %s3407_s2 }
  0x89   : > { %3079 = vmatprep.subr.mxu1 %v3505_v0  ;;  %3063 = vmatmul.mubr.msk.f32.vlgmr.msra.gmra.mxu0 %vm385_vm8, %v1077_v32  ;;  %v1586_v61 = vsel %vm380_vm6, %v1585_v57, %v1584_v59  ;;  %s3409_s3 = scalar_lea.vmem %s3408_s2, 256  ;;  %p3410_p11 = scmp.lt.s32.totalorder %s2739_s6, %s3408_s2 }
  0x8a   : > { %3070 = vmatmul.mubr.msk.f32.vlgmr.msra.gmra.mxu1 %vm385_vm8, %v1077_v32  ;;  %3072 = vmatprep.subr.mxu0 %v3505_v0  ;;  %v1588_v62 = vsel %vm383_vm7, %v1587_v60, %v1586_v61  ;;  %p3405_p3 = pnand %p3404_p4, %p3632_p9  ;;  %p3411_p5 = scmp.lt.s32.totalorder %s3409_s3, %s3403_s12 }
  0x8b   : > { %3080 = vmatpush3.msra.mxu1 %v3710_v1  ;;  %3073 = vmatpush3.msra.mxu0 %v3712_v2 }
  0x8c   : > { %3081 = vmatprep.subr.mxu1 %v3505_v0  ;;  %3074 = vmatprep.subr.mxu0 %v3505_v0  ;;  %p3406_p7 = pneg %p3405_p3  ;;  %p3412_p10 = por %p3411_p5, %p3410_p11 }
  0x8d   : > { %3082 = vmatpush3.msra.mxu1 %v3714_v3  ;;  %3075 = vmatpush3.msra.mxu0 %v3718_v4 }
  0x8e   : > { %3076 = vmatprep.mubr.msk.f32.mxu0 %vm3506_vm0, %v3505_v0  ;;  %3083 = vmatprep.mubr.msk.f32.mxu1 %vm3506_vm0, %v3505_v0  ;;  %p3413_p1 = pnand %p3412_p10, %p3406_p7 }
  0x8f   : > { %3093 = vmatprep.subr.mxu1 %v3505_v0  ;;  %3077 = vmatmul.mubr.msk.f32.vlgmr.msra.gmra.mxu0 %vm385_vm8, %v1242_v48 }
  0x90   : > { %3084 = vmatmul.mubr.msk.f32.vlgmr.msra.gmra.mxu1 %vm385_vm8, %v1242_v48  ;;  %3086 = vmatprep.subr.mxu0 %v3505_v0 }
  0x91   : > { %3094 = vmatpush3.msra.mxu1 %v3710_v1  ;;  %3087 = vmatpush3.msra.mxu0 %v3712_v2 }
  0x92   : > { %3095 = vmatprep.subr.mxu1 %v3505_v0  ;;  %3088 = vmatprep.subr.mxu0 %v3505_v0 }
  0x93   : > { %3096 = vmatpush3.msra.mxu1 %v3714_v3  ;;  %3089 = vmatpush3.msra.mxu0 %v3718_v4 }
  0x94   : > { %3090 = vmatprep.mubr.msk.f32.mxu0 %vm3506_vm0, %v3505_v0  ;;  %3097 = vmatprep.mubr.msk.f32.mxu1 %vm3506_vm0, %v3505_v0 }
  0x95   : > { %3107 = vmatprep.subr.mxu1 %v3505_v0  ;;  %3091 = vmatmul.mubr.msk.f32.vlgmr.msra.gmra.mxu0 %vm385_vm8, %v1423_v58 }
  0x96   : > { %3098 = vmatmul.mubr.msk.f32.vlgmr.msra.gmra.mxu1 %vm385_vm8, %v1423_v58  ;;  %3100 = vmatprep.subr.mxu0 %v3505_v0 }
  0x97   : > { %3108 = vmatpush3.msra.mxu1 %v3710_v1  ;;  %3101 = vmatpush3.msra.mxu0 %v3712_v2 }
  0x98   : > { %3109 = vmatprep.subr.mxu1 %v3505_v0  ;;  %3102 = vmatprep.subr.mxu0 %v3505_v0 }
  0x99   : > { %3110 = vmatpush3.msra.mxu1 %v3714_v3  ;;  %3103 = vmatpush3.msra.mxu0 %v3718_v4 }
  0x9a   : > { %3104 = vmatprep.mubr.msk.f32.mxu0 %vm3506_vm0, %v3505_v0  ;;  %3111 = vmatprep.mubr.msk.f32.mxu1 %vm3506_vm0, %v3505_v0 }
  0x9b   : > { %3105 = vmatmul.mubr.msk.f32.vlgmr.msra.gmra.mxu0 %vm385_vm8, %v1588_v62  ;;  %3112 = vmatmul.mubr.msk.f32.vlgmr.msra.gmra.mxu1 %vm385_vm8, %v1588_v62 }
  0x9c   : > { %3114 = vmatprep.subr.mxu0 %v3505_v0  ;;  %3121 = vmatprep.subr.mxu1 %v3505_v0 }
  0x9d   : > { %3115 = vmatpush3.msra.mxu0 %v3712_v2  ;;  %3122 = vmatpush3.msra.mxu1 %v3710_v1 }
  0x9e   : > { %3116 = vmatprep.subr.mxu0 %v3505_v0  ;;  %3123 = vmatprep.subr.mxu1 %v3505_v0 }
  0x9f   : > { %3117 = vmatpush3.msra.mxu0 %v3718_v4  ;;  %3124 = vmatpush3.msra.mxu1 %v3714_v3 }
  0xa0   : > { %3118 = vmatprep.mubr.msk.f32.mxu0 %vm3506_vm0, %v3505_v0  ;;  %3125 = vmatprep.mubr.msk.f32.mxu1 %vm3506_vm0, %v3505_v0 }
  0xa1   : > { %3128 = vmatprep.subr.mxu0 %v3505_v0  ;;  %3135 = vmatprep.subr.mxu1 %v3505_v0 }
 0x132   : > { %v3964_v63 = vpop.f32.mrf.mxu0  ;;  %v524_v5 = vpop.f32.mrf.mxu1 }
 0x133   : > { %v3989_v39 = vsub.f32 0.0, %v524_v5 }
 0x134   : > { %v3008_v6 = vpop.f32.mrf.mxu0  ;;  %v3015_v7 = vpop.f32.mrf.mxu1 }
 0x137   : > { %v3966_v8 = vpop.f32.mrf.mxu0 }
 0x138   : > { %v689_v9 = vpop.f32.mrf.mxu1 }
 0x139   : > { %v3022_v10 = vpop.f32.mrf.mxu0  ;;  %v693_v40 = vsub.f32 0.0, %v689_v9 }
 0x13a   : > { %v3029_v11 = vpop.f32.mrf.mxu1 }
 0x13d   : > { %v3968_v12 = vpop.f32.mrf.mxu0 }
 0x13e   : > { %v870_v13 = vpop.f32.mrf.mxu1  ;;  %v1732_v43 = vadd.f32 %v3968_v12, %v3964_v63  ;;  %v1904_v44 = vsub.f32 0.0, %v3968_v12 }
 0x13f   : > { %v3036_v14 = vpop.f32.mrf.mxu0  ;;  %v3982_v32 = vsub.f32 0.0, %v870_v13 }
 0x140   : > { %v3043_v15 = vpop.f32.mrf.mxu1 }
 0x141   : > { %v1735_v45 = vadd.f32 %v3982_v32, %v3989_v39 }
 0x143   : > { %v3970_v16 = vpop.f32.mrf.mxu0 }
 0x144   : > { %v1035_v17 = vpop.f32.mrf.mxu1  ;;  %v1738_v41 = vadd.f32 %v3970_v16, %v3966_v8  ;;  %v1914_v61 = vsub.f32 0.0, %v3970_v16 }
 0x145   : > { %v3050_v18 = vpop.f32.mrf.mxu0  ;;  %v3984_v33 = vsub.f32 0.0, %v1035_v17 }
 0x146   : > { %v3057_v19 = vpop.f32.mrf.mxu1 }
 0x147   : > { %v1741_v46 = vadd.f32 %v3984_v33, %v693_v40 }
 0x149   : > { %v3972_v20 = vpop.f32.mrf.mxu0 }
 0x14a   : > { %v1216_v21 = vpop.f32.mrf.mxu1  ;;  %v1897_v42 = vsub.f32 0.0, %v3972_v20  ;;  %v1733_v55 = vadd.f32 %v1732_v43, %v3972_v20 }
 0x14b   : > { %v3064_v22 = vpop.f32.mrf.mxu0  ;;  %v3976_v28 = vsub.f32 0.0, %v1216_v21 }
 0x14c   : > { %v3071_v23 = vpop.f32.mrf.mxu1  ;;  %v4017_v56 = vadd.f32 %v1897_v42, %v3964_v63 }
 0x14d   : > { %v1902_v34 = vsub.f32 0.0, %v3976_v28  ;;  %v1736_v62 = vadd.f32 %v1735_v45, %v3976_v28 }
 0x14e   : > { %v1899_v15 = vadd.f32 %v4017_v56, %v3982_v32 }
 0x14f   : > { %v3974_v24 = vpop.f32.mrf.mxu0  ;;  %v4001_v47 = vadd.f32 %v1902_v34, %v3989_v39  ;;  %v2222_v34 = vsub.f32 0.0, %v3984_v33 }
 0x150   : > { %v1381_v25 = vpop.f32.mrf.mxu1  ;;  %v1907_v36 = vsub.f32 0.0, %v3974_v24  ;;  %v1739_v48 = vadd.f32 %v1738_v41, %v3974_v24 }
 0x151   : > { %v3078_v26 = vpop.f32.mrf.mxu0  ;;  %v3978_v29 = vsub.f32 0.0, %v1381_v25  ;;  %v1905_v6 = vadd.f32 %v1904_v44, %v4001_v47 }
 0x152   : > { %v3085_v27 = vpop.f32.mrf.mxu1  ;;  %v4007_v51 = vadd.f32 %v1907_v36, %v3966_v8 }
 0x153   : > { %v1912_v37 = vsub.f32 0.0, %v3978_v29  ;;  %v1742_v57 = vadd.f32 %v1741_v46, %v3978_v29  ;;  %v2218_v46 = vadd.f32 %v1914_v61, %v3966_v8 }
 0x154   : > { %v1909_v10 = vadd.f32 %v4007_v51, %v3984_v33  ;;  %v2223_v33 = vadd.f32 %v2222_v34, %v693_v40 }
 0x155   : > { %v3980_v30 = vpop.f32.mrf.mxu0  ;;  %v4009_v52 = vadd.f32 %v1912_v37, %v693_v40  ;;  %v2214_v37 = vsub.f32 0.0, %v3982_v32  ;;  %v2210_v32 = vadd.f32 %v1904_v44, %v3964_v63  ;;  %v2219_v8 = vadd.f32 %v2218_v46, %v3974_v24 }
 0x156   : > { %v1562_v31 = vpop.f32.mrf.mxu1  ;;  %v1734_v5 = vadd.f32 %v1733_v55, %v3980_v30  ;;  %v1906_v23 = vadd.f32 %v1905_v6, %v3980_v30  ;;  %v2224_v40 = vadd.f32 %v2223_v33, %v3978_v29  ;;  %v2383_v55 = vadd.f32 %v2222_v34, %v4007_v51 }
 0x157   : > { %v3092_v35 = vpop.f32.mrf.mxu0  ;;  %v4011_v53 = vsub.f32 0.0, %v1562_v31  ;;  %v1915_v14 = vadd.f32 %v1914_v61, %v4009_v52  ;;  %v2215_v45 = vadd.f32 %v2214_v37, %v3989_v39  ;;  %v2211_v63 = vadd.f32 %v2210_v32, %v3972_v20 }
 0x158   : > { %v3099_v38 = vpop.f32.mrf.mxu1  ;;  %v2385_v24 = vadd.f32 %v4009_v52, %v3970_v16 }
 0x159   : > { %v1737_v11 = vadd.f32 %v1736_v62, %v4011_v53  ;;  %v1900_v13 = vsub.f32 0.0, %v4011_v53  ;;  %v2216_v39 = vadd.f32 %v2215_v45, %v3976_v28 }
 0x15b   : > { %v4004_v49 = vpop.f32.mrf.mxu0  ;;  %v1727_v50 = vpop.f32.mrf.mxu1  ;;  %v1901_v25 = vadd.f32 %v1900_v13, %v1899_v15 }
 0x15c   : > { %v4013_v54 = vsub.f32 0.0, %v1727_v50  ;;  %v1740_v58 = vadd.f32 %v1739_v48, %v4004_v49  ;;  %v1916_v26 = vadd.f32 %v1915_v14, %v4004_v49  ;;  %v2212_v48 = vsub.f32 0.0, %v3980_v30 }
 0x15d   : > { %v3106_v59 = vpop.f32.mrf.mxu0  ;;  %v3113_v60 = vpop.f32.mrf.mxu1  ;;  %v2220_v50 = vsub.f32 0.0, %v4004_v49  ;;  %v2217_v30 = vadd.f32 %v2216_v39, %v1900_v13 }
 0x15e   : > { %v1743_v7 = vadd.f32 %v1742_v57, %v4013_v54  ;;  %v1910_v9 = vsub.f32 0.0, %v4013_v54  ;;  %v1744_v17 = vmul.f32 %v1740_v58, %v1734_v5  ;;  %v1747_v18 = vmul.f32 %v1740_v58, %v1737_v11 }
 0x15f   : > { %v1918_v38 = vmul.f32 %v1916_v26, %v1906_v23  ;;  %v1921_v41 = vmul.f32 %v1916_v26, %v1901_v25  ;;  %v2213_v29 = vadd.f32 %v2212_v48, %v2211_v63  ;;  %v2221_v20 = vadd.f32 %v2220_v50, %v2219_v8 }
 0x160   : > { %v1745_v19 = vmul.f32 %v1743_v7, %v1737_v11  ;;  %v1748_v21 = vmul.f32 %v1743_v7, %v1734_v5  ;;  %v1911_v22 = vadd.f32 %v1910_v9, %v1909_v10  ;;  %v2225_v44 = vadd.f32 %v2224_v40, %v1910_v9 }
 0x161   : > { %v2381_v57 = vadd.f32 %v4001_v47, %v3968_v12  ;;  %v2379_v58 = vadd.f32 %v2214_v37, %v4017_v56  ;;  %v2386_v59 = vadd.f32 %v2385_v24, %v2220_v50  ;;  %v2226_v16 = vmul.f32 %v2221_v20, %v2213_v29 }
 0x162   : > { %v1746_v27 = vadd.f32 %v1745_v19, %v1744_v17  ;;  %v1749_v31 = vsub.f32 %v1747_v18, %v1748_v21  ;;  %v1917_v35 = vmul.f32 %v1911_v22, %v1901_v25  ;;  %v1920_v36 = vmul.f32 %v1911_v22, %v1906_v23 }
 0x163   : > { %v2227_v28 = vmul.f32 %v2225_v44, %v2217_v30  ;;  %v2230_v49 = vmul.f32 %v2225_v44, %v2213_v29  ;;  %v2229_v52 = vmul.f32 %v2221_v20, %v2217_v30  ;;  %v2384_v60 = vadd.f32 %v2383_v55, %v4013_v54 }
 0x164   : > { %3119 = vmatmul.mubr.msk.f32.vlgmr.msra.gmra.mxu0 %vm385_vm8, %v1746_v27  ;;  %3126 = vmatmul.mubr.msk.f32.vlgmr.msra.gmra.mxu1 %vm385_vm8, %v1749_v31  ;;  %v1919_v42 = vadd.f32 %v1918_v38, %v1917_v35  ;;  %v1922_v43 = vsub.f32 %v1920_v36, %v1921_v41  ;;  %v2382_v51 = vadd.f32 %v2381_v57, %v2212_v48  ;;  %v2911_v57 = vld [vmem:[%s4174_s4] ss:$0 sm:$0xff] }
 0x165   : > { %3129 = vmatpush3.msra.mxu0 %v3712_v2  ;;  %3136 = vmatpush3.msra.mxu1 %v3710_v1  ;;  %v2380_v12 = vadd.f32 %v2379_v58, %v4011_v53  ;;  %v2228_v47 = vadd.f32 %v2227_v28, %v2226_v16  ;;  %v2231_v56 = vsub.f32 %v2229_v52, %v2230_v49 }
 0x166   : > { %3130 = vmatprep.subr.mxu0 %v3505_v0  ;;  %3137 = vmatprep.subr.mxu1 %v3505_v0  ;;  %v2388_v54 = vmul.f32 %v2386_v59, %v2382_v51  ;;  %v2390_v5 = vmul.f32 %v2384_v60, %v2382_v51 }
 0x167   : > { %3131 = vmatpush3.msra.mxu0 %v3718_v4  ;;  %3138 = vmatpush3.msra.mxu1 %v3714_v3  ;;  %v2391_v61 = vmul.f32 %v2386_v59, %v2380_v12  ;;  %v2387_v62 = vmul.f32 %v2384_v60, %v2380_v12 }
 0x168   : > { %3132 = vmatprep.mubr.msk.f32.mxu0 %vm3506_vm0, %v3505_v0  ;;  %3139 = vmatprep.mubr.msk.f32.mxu1 %vm3506_vm0, %v3505_v0 }
 0x169   : > { %3142 = vmatprep.subr.mxu0 %v3505_v0  ;;  %3149 = vmatprep.subr.mxu1 %v3505_v0  ;;  %v2389_v53 = vadd.f32 %v2388_v54, %v2387_v62  ;;  %v2392_v6 = vsub.f32 %v2390_v5, %v2391_v61 }
 0x16a   : > { %3133 = vmatmul.mubr.msk.f32.vlgmr.msra.gmra.mxu0 %vm385_vm8, %v1919_v42  ;;  %3140 = vmatmul.mubr.msk.f32.vlgmr.msra.gmra.mxu1 %vm385_vm8, %v1922_v43 }
 0x16b   : > { %3143 = vmatpush3.msra.mxu0 %v3712_v2  ;;  %3150 = vmatpush3.msra.mxu1 %v3710_v1 }
 0x16c   : > { %3144 = vmatprep.subr.mxu0 %v3505_v0  ;;  %3151 = vmatprep.subr.mxu1 %v3505_v0 }
 0x16d   : > { %3145 = vmatpush3.msra.mxu0 %v3718_v4  ;;  %3152 = vmatpush3.msra.mxu1 %v3714_v3 }
 0x16e   : > { %3146 = vmatprep.mubr.msk.f32.mxu0 %vm3506_vm0, %v3505_v0  ;;  %3153 = vmatprep.mubr.msk.f32.mxu1 %vm3506_vm0, %v3505_v0 }
 0x16f   : > { %3156 = vmatprep.subr.mxu0 %v3505_v0  ;;  %3163 = vmatprep.subr.mxu1 %v3505_v0 }
 0x170   : > { %3147 = vmatmul.mubr.msk.f32.vlgmr.msra.gmra.mxu0 %vm385_vm8, %v1922_v43  ;;  %3154 = vmatmul.mubr.msk.f32.vlgmr.msra.gmra.mxu1 %vm385_vm8, %v1919_v42 }
 0x171   : > { %3157 = vmatpush3.msra.mxu0 %v3712_v2  ;;  %3164 = vmatpush3.msra.mxu1 %v3710_v1 }
 0x172   : > { %3158 = vmatprep.subr.mxu0 %v3505_v0  ;;  %3165 = vmatprep.subr.mxu1 %v3505_v0 }
 0x173   : > { %3159 = vmatpush3.msra.mxu0 %v3718_v4  ;;  %3166 = vmatpush3.msra.mxu1 %v3714_v3 }
 0x174   : > { %3160 = vmatprep.mubr.msk.f32.mxu0 %vm3506_vm0, %v3505_v0  ;;  %3167 = vmatprep.mubr.msk.f32.mxu1 %vm3506_vm0, %v3505_v0 }
 0x175   : > { %3170 = vmatprep.subr.mxu0 %v3505_v0  ;;  %3177 = vmatprep.subr.mxu1 %v3505_v0 }
 0x176   : > { %3161 = vmatmul.mubr.msk.f32.vlgmr.msra.gmra.mxu0 %vm385_vm8, %v2228_v47  ;;  %3168 = vmatmul.mubr.msk.f32.vlgmr.msra.gmra.mxu1 %vm385_vm8, %v2231_v56 }
 0x177   : > { %3171 = vmatpush3.msra.mxu0 %v3712_v2  ;;  %3178 = vmatpush3.msra.mxu1 %v3710_v1 }
 0x178   : > { %3172 = vmatprep.subr.mxu0 %v3505_v0  ;;  %3179 = vmatprep.subr.mxu1 %v3505_v0 }
 0x179   : > { %3173 = vmatpush3.msra.mxu0 %v3718_v4  ;;  %3180 = vmatpush3.msra.mxu1 %v3714_v3 }
 0x17a   : > { %3174 = vmatprep.mubr.msk.f32.mxu0 %vm3506_vm0, %v3505_v0  ;;  %3181 = vmatprep.mubr.msk.f32.mxu1 %vm3506_vm0, %v3505_v0 }
 0x17b   : > { %3184 = vmatprep.subr.mxu0 %v3505_v0  ;;  %3191 = vmatprep.subr.mxu1 %v3505_v0 }
 0x17c   : > { %3175 = vmatmul.mubr.msk.f32.vlgmr.msra.gmra.mxu0 %vm385_vm8, %v2389_v53  ;;  %3182 = vmatmul.mubr.msk.f32.vlgmr.msra.gmra.mxu1 %vm385_vm8, %v2392_v6 }
 0x17d   : > { %3185 = vmatpush3.msra.mxu0 %v3712_v2  ;;  %3192 = vmatpush3.msra.mxu1 %v3710_v1 }
 0x17e   : > { %3186 = vmatprep.subr.mxu0 %v3505_v0  ;;  %3193 = vmatprep.subr.mxu1 %v3505_v0 }
 0x17f   : > { %3187 = vmatpush3.msra.mxu0 %v3718_v4  ;;  %3194 = vmatpush3.msra.mxu1 %v3714_v3 }
 0x180   : > { %3188 = vmatprep.mubr.msk.f32.mxu0 %vm3506_vm0, %v3505_v0  ;;  %3195 = vmatprep.mubr.msk.f32.mxu1 %vm3506_vm0, %v3505_v0 }
 0x181   : > { %3189 = vmatmul.mubr.msk.f32.vlgmr.msra.gmra.mxu0 %vm385_vm8, %v2392_v6  ;;  %3196 = vmatmul.mubr.msk.f32.vlgmr.msra.gmra.mxu1 %vm385_vm8, %v2389_v53 }
 0x224   : > { %v1819_v2 = vpop.f32.mrf.mxu0  ;;  %v1892_v1 = vpop.f32.mrf.mxu1 }
 0x225   : > { %v1896_v13 = vsub.f32 %v1819_v2, %v1892_v1 }
 0x226   : > { %v3120_v7 = vpop.f32.mrf.mxu0  ;;  %v3127_v9 = vpop.f32.mrf.mxu1 }
 0x22a   : > { %v1992_v10 = vpop.f32.mrf.mxu0  ;;  %v2065_v11 = vpop.f32.mrf.mxu1 }
 0x22b   : > { %v2069_v4 = vsub.f32 %v1992_v10, %v2065_v11 }
 0x22c   : > { %v3134_v14 = vpop.f32.mrf.mxu0  ;;  %v3141_v3 = vpop.f32.mrf.mxu1 }
 0x22d   : > { %v2680_v15 = vadd.f32 %v2069_v4, %v1896_v13  ;;  %v2688_v42 = vsub.f32 0.0, %v2069_v4 }
 0x22f   : > { %v2689_v50 = vadd.f32 %v2688_v42, %v1896_v13 }
 0x230   : > { %v2136_v17 = vpop.f32.mrf.mxu0  ;;  %v2206_v18 = vpop.f32.mrf.mxu1 }
 0x231   : > { %v2207_v34 = vadd.f32 %v2206_v18, %v2136_v17 }
 0x232   : > { %v3148_v19 = vpop.f32.mrf.mxu0  ;;  %v3155_v21 = vpop.f32.mrf.mxu1 }
 0x233   : > { %v2685_v32 = vsub.f32 0.0, %v2207_v34 }
 0x236   : > { %v2301_v0 = vpop.f32.mrf.mxu0  ;;  %v2374_v22 = vpop.f32.mrf.mxu1 }
 0x237   : > { %v2378_v23 = vsub.f32 %v2301_v0, %v2374_v22 }
 0x238   : > { %v3162_v25 = vpop.f32.mrf.mxu0  ;;  %v3169_v26 = vpop.f32.mrf.mxu1 }
 0x239   : > { %v2681_v27 = vadd.f32 %v2680_v15, %v2378_v23  ;;  %v2683_v31 = vsub.f32 0.0, %v2378_v23  ;;  %v2690_v20 = vadd.f32 %v2689_v50, %v2378_v23 }
 0x23b   : > { %v2684_v33 = vadd.f32 %v2683_v31, %v1896_v13 }
 0x23c   : > { %v2462_v35 = vpop.f32.mrf.mxu0  ;;  %v2535_v36 = vpop.f32.mrf.mxu1 }
 0x23d   : > { %v2539_v37 = vsub.f32 %v2462_v35, %v2535_v36  ;;  %v2686_v48 = vadd.f32 %v2685_v32, %v2684_v33  ;;  %v2693_v30 = vadd.f32 %v2684_v33, %v2207_v34 }
 0x23e   : > { %v3176_v38 = vpop.f32.mrf.mxu0  ;;  %v3183_v41 = vpop.f32.mrf.mxu1 }
 0x23f   : > { %v2682_v43 = vadd.f32 %v2681_v27, %v2539_v37  ;;  %v2691_v8 = vsub.f32 0.0, %v2539_v37 }
 0x241   : > { %v2606_v45 = vpop.f32.mrf.mxu0  ;;  %v2676_v46 = vpop.f32.mrf.mxu1  ;;  %v2692_v28 = vadd.f32 %v2691_v8, %v2690_v20 }
 0x242   : > { %v2677_v40 = vadd.f32 %v2676_v46, %v2606_v45 }
 0x243   : > { %v3190_v63 = vpop.f32.mrf.mxu0  ;;  %v3197_v39 = vpop.f32.mrf.mxu1 }
 0x244   : > { %v2694_v44 = vsub.f32 0.0, %v2677_v40  ;;  %v2687_v29 = vadd.f32 %v2686_v48, %v2677_v40 }
 0x246   : > { %2697 = vrot.lane.b32.xlu0 %v2687_v29, %s3507_s24  ;;  %v2695_v24 = vadd.f32 %v2694_v44, %v2693_v30 }
 0x248   : > { %2705 = vrot.lane.b32.xlu1 %v2695_v24, %s3508_s26 }
 0x24a   : > { %2701 = vrot.lane.b32.xlu0 %v2692_v28, %s3509_s8 }
 0x2b8   : > { %v2698_v49 = vpop.permute.xlu0 %2697 }
 0x2b9   : > { %v2708_v55 = vsel %vm385_vm8, %v2682_v43, %v2698_v49 }
 0x2ba   : > { %v2706_v59 = vpop.permute.xlu1 %2705 }
 0x2bc   : > { %v2702_v58 = vpop.permute.xlu0 %2701 }
 0x2bd   : > { %v2710_v16 = vsel %vm2709_vm9, %v2708_v55, %v2702_v58 }
 0x2be   : > { %v2712_v52 = vsel %vm2711_vm10, %v2710_v16, %v2706_v59 }
 0x2bf   : > { %v2720_v60 = vmul.f32 %v2911_v57, %v2712_v52 }
 0x2c1   : > { %2722 = vst.msk [vmem:[%s333_s13] sm:$0xff] %vm2721_vm11, %v2720_v60 }
 0x2c2   : > { %3416 = shalt.err (!%p3413_p1)
}
 0x2c3   : > { %s3417_s7 = scalar_lea.hbm %s2736_s25, 128  ;;  %s3421_s28 = scalar_lea.hbm %s4175_s5, 256 }
 0x2c4   : > { %p3418_p2 = scmp.ne.s32.totalorder %s2736_s25, %s3417_s7  ;;  %p3422_p13 = scmp.lt.s32.totalorder %s2736_s25, %s4175_s5 }
 0x2c5   : > { %p3423_p0 = scmp.lt.s32.totalorder %s3421_s28, %s3417_s7 }
 0x2c6   : > { %p3419_p6 = pnand %p3418_p2, %p3632_p9 }
 0x2c7   : > { %p3424_p12 = por %p3423_p0, %p3422_p13 }
 0x2c8   : > { %p3420_p8 = pneg %p3419_p6 }
 0x2ca   : > { %p3425_p4 = pnand %p3424_p12, %p3420_p8 }
 0x2cc   : > { %3428 = shalt.err (!%p3425_p4)
}
 0x2cd   : > { %3210 = dma.vmem_to_hbm [thread:$0]  (%p3632_p9), %s2739_s6, 128, %s2736_s25, %s2724_s11  }
 0x2ce PF: > { %s2750_s26 = sand.u32 1, %s3475_s18   ;;  %p4199_p3 = scmp.ne.s32.totalorder %s4184_s27, 0 }
 0x2cf   : > { %p4200_p7 = scmp.ge.s32.totalorder %s3495_s23, 2  ;;  %s2751_s8 = scalar_lea.sflag [#allocation4], %s2750_s26 }
 0x2d1   : > { %p3227_p11 = pnand %p4200_p7, %p4199_p3 }
 0x2d3   : > { %p3228_p5 = pneg %p3227_p11 }
 0x2d5   : > { %3470 = dma.done.wait (%p3228_p5), %s2751_s8, 128  }
 0x2d6   : > { %3472 = vsyncadd (%p3228_p5), %s2751_s8, 4294967168  ;;  %s25_s23 = sadd.s32 1, %s3495_s23   ;;  %s4201_s9 = sld [smem:[#allocation16_spill]] }
 0x2d7   : > { %p22_p10 = scmp.ge.s32.totalorder %s25_s23, 4   ;;  %s4202_s20 = sld [smem:[#allocation18_spill]] }
 0x2d8   : > { %s4203_s29 = sld [smem:[#allocation17_spill]]  ;;  %s4204_s18 = smov %s3479_s19 }
 0x2d9   : > { %s4206_s21 = smov %s3491_s22 }
 0x2da   :  { %24 = sbr.rel (!%p22_p10) target bundleno = 13 (0xd), region = 106 }
 0x2dc   : > { %s4205_s19 = smov %s4201_s9 }
 0x2de   : > { %s4207_s22 = smov %s4203_s29 }
 0x2df   :  { %2756 = vsyncpa [#allocation3], 1 }
 0x2e0   :  { %2758 = vsyncpa [#allocation3 + $0x1], 1 }
 0x2e1   :  { %2759 = vsyncpa [#allocation6], 1 }
 0x2e2   :  { %2761 = vsyncpa [#allocation6 + $0x1], 1 }
 0x2e3   :  { %2762 = vsyncpa [#allocation9], 1 }
 0x2e4   :  { %2763 = vsyncpa [#allocation4], 1 }
 0x2e5   :  { %2765 = vsyncpa [#allocation4 + $0x1], 1 }

</bundles_post_ra>
